<compile_context>
chip_gen: v6e
topology: v6e:2x2x1
jax: 0.10.0
libtpu: 0.0.40
codegen_flags: <defaults>
</compile_context>

<pallas_src>
import jax
import jax.numpy as jnp
from jax import lax
from jax.experimental import pallas as pl
from jax.experimental.pallas import tpu as pltpu

_HIGHEST = jax.lax.Precision.HIGHEST


def _round_up(x, m):
    return ((x + m - 1) // m) * m


# ----------------------------------------------------------------------------
# Pallas GRU kernel: one grid step == one chunk of (dilated) time.
# Layout inside the kernel is 2-D "(time*batch_padded, feature)".
# ----------------------------------------------------------------------------
def _gru_layer_kernel(x_ref, wir_ref, wiz_ref, win_ref,
                      whr_ref, whz_ref, whn_ref,
                      br_ref, bz_ref, bni_ref, bnh_ref,
                      o_ref,
                      gir_s, giz_s, gin_s, h_ref):
    """x_ref        : (Tc*Bp, D)  chunk of inputs (time-major, batch padded to 8k)
    wir/wiz/win_ref : (D, H)      input->gate weights, contracting dim first
    whr/whz/whn_ref : (H, H)      hidden->gate weights, contracting dim first
    br/bz/bni/bnh   : (1, H)      folded biases (r, z, n-input, n-hidden)
    o_ref           : (Tc*Bp, H)  output block for this chunk
    gir/giz/gin_s   : (Tc*Bp, H)  VMEM scratch holding the chunk's input proj.
    h_ref           : (Bp, H)     recurrent state, persists across chunks
    """
    b_pad = h_ref.shape[0]
    t_chunk = o_ref.shape[0] // b_pad

    @pl.when(pl.program_id(0) == 0)
    def _():
        h_ref[...] = jnp.zeros_like(h_ref)   # init_hidden -> zeros

    # Time-parallel input projection for the whole chunk: one big MXU GEMM per
    # gate, written to VMEM scratch (biases folded in).
    x = x_ref[...]
    gir_s[...] = jnp.dot(x, wir_ref[...],
                         preferred_element_type=jnp.float32) + br_ref[...]
    giz_s[...] = jnp.dot(x, wiz_ref[...],
                         preferred_element_type=jnp.float32) + bz_ref[...]
    gin_s[...] = jnp.dot(x, win_ref[...],
                         preferred_element_type=jnp.float32) + bni_ref[...]

    w_r = whr_ref[...]
    w_z = whz_ref[...]
    w_n = whn_ref[...]
    b_hn = bnh_ref[...]                      # (1, H), broadcasts over batch

    def step(t, h):
        off = pl.multiple_of(t * b_pad, 8)   # aligned sublane slab
        # Only the hidden->gate projection is in the sequential loop.
        h_r = jnp.dot(h, w_r, preferred_element_type=jnp.float32)
        h_z = jnp.dot(h, w_z, preferred_element_type=jnp.float32)
        h_n = jnp.dot(h, w_n, preferred_element_type=jnp.float32)
        r = jax.nn.sigmoid(gir_s[pl.ds(off, b_pad), :] + h_r)
        z = jax.nn.sigmoid(giz_s[pl.ds(off, b_pad), :] + h_z)
        n = jnp.tanh(gin_s[pl.ds(off, b_pad), :] + r * (h_n + b_hn))
        h_new = n + z * (h - n)
        o_ref[pl.ds(off, b_pad), :] = h_new.astype(o_ref.dtype)
        return h_new

    h_ref[...] = lax.fori_loop(0, t_chunk, step, h_ref[...],
                               unroll=(t_chunk <= 32))


def gru_layer_pallas(x_dil, w_ih, w_hh, b_ih, b_hh):
    """Single-layer GRU over x_dil (T, B_eff, D), zero initial state.

    w_ih: (3H, D), w_hh: (3H, H), b_ih/b_hh: (3H,)  -- PyTorch nn.GRU layout,
    gate order r, z, n.  Returns outputs (T, B_eff, H) and last output (B_eff, H).
    """
    T, B, D = x_dil.shape
    H = w_hh.shape[1]

    x = x_dil.astype(jnp.float32)
    w_ih = jnp.asarray(w_ih, jnp.float32)
    w_hh = jnp.asarray(w_hh, jnp.float32)
    b_ih = jnp.asarray(b_ih, jnp.float32)
    b_hh = jnp.asarray(b_hh, jnp.float32)

    # Split weights / biases per gate (PyTorch order: r, z, n).
    wih_r, wih_z, wih_n = w_ih[:H], w_ih[H:2 * H], w_ih[2 * H:]
    whh_r, whh_z, whh_n = w_hh[:H], w_hh[H:2 * H], w_hh[2 * H:]
    bih_r, bih_z, bih_n = b_ih[:H], b_ih[H:2 * H], b_ih[2 * H:]
    bhh_r, bhh_z, bhh_n = b_hh[:H], b_hh[H:2 * H], b_hh[2 * H:]

    # Sublane-align the (dilated) batch so every per-timestep access inside the
    # kernel is an aligned dynamic sublane slab.
    B_pad = _round_up(max(B, 1), 8)

    # VMEM budget -> chunk of dilated time per grid step.
    # Per timestep bytes: 2x x-block + 2x out-block (double-buffered) + 3 gi scratch.
    bytes_per_t = B_pad * 4 * (2 * D + 5 * H)
    budget = 16 * 1024 * 1024                      # headroom for v7x 64 MiB/TC
    t_chunk = int(max(1, min(T, budget // max(bytes_per_t, 1))))
    num_chunks = pl.cdiv(T, t_chunk)
    T_pad = num_chunks * t_chunk

    x_p = jnp.pad(x, ((0, T_pad - T), (0, B_pad - B), (0, 0)))
    x2d = x_p.reshape(T_pad * B_pad, D)            # contiguous reshape, no copy

    out2d = pl.pallas_call(
        _gru_layer_kernel,
        out_shape=jax.ShapeDtypeStruct((T_pad * B_pad, H), jnp.float32),
        grid=(num_chunks,),
        in_specs=[
            pl.BlockSpec((t_chunk * B_pad, D), lambda c: (c, 0)),   # x chunk
            pl.BlockSpec((D, H), lambda c: (0, 0)),                 # W_ih_r^T
            pl.BlockSpec((D, H), lambda c: (0, 0)),                 # W_ih_z^T
            pl.BlockSpec((D, H), lambda c: (0, 0)),                 # W_ih_n^T
            pl.BlockSpec((H, H), lambda c: (0, 0)),                 # W_hh_r^T
            pl.BlockSpec((H, H), lambda c: (0, 0)),                 # W_hh_z^T
            pl.BlockSpec((H, H), lambda c: (0, 0)),                 # W_hh_n^T
            pl.BlockSpec((1, H), lambda c: (0, 0)),                 # b_r folded
            pl.BlockSpec((1, H), lambda c: (0, 0)),                 # b_z folded
            pl.BlockSpec((1, H), lambda c: (0, 0)),                 # b_ih_n
            pl.BlockSpec((1, H), lambda c: (0, 0)),                 # b_hh_n
        ],
        out_specs=pl.BlockSpec((t_chunk * B_pad, H), lambda c: (c, 0)),
        scratch_shapes=[
            pltpu.VMEM((t_chunk * B_pad, H), jnp.float32),   # gi_r
            pltpu.VMEM((t_chunk * B_pad, H), jnp.float32),   # gi_z
            pltpu.VMEM((t_chunk * B_pad, H), jnp.float32),   # gi_n
            pltpu.VMEM((B_pad, H), jnp.float32),             # hidden state
        ],
        compiler_params=pltpu.CompilerParams(
            dimension_semantics=("arbitrary",),              # sequential recurrence
            vmem_limit_bytes=48 * 1024 * 1024),
    )(x2d,
      wih_r.T, wih_z.T, wih_n.T,
      whh_r.T, whh_z.T, whh_n.T,
      (bih_r + bhh_r).reshape(1, H),
      (bih_z + bhh_z).reshape(1, H),
      bih_n.reshape(1, H),
      bhh_n.reshape(1, H))

    out = out2d.reshape(T_pad, B_pad, H)[:T, :B, :]
    return out, out[-1]


# ----------------------------------------------------------------------------
# Dilated-RNN plumbing (mirrors the PyTorch module, in plain JAX)
# ----------------------------------------------------------------------------
def _pad_inputs(inputs, n_steps, rate):
    if n_steps % rate != 0:
        dilated_steps = n_steps // rate + 1
        pad_len = dilated_steps * rate - n_steps
        zeros_ = jnp.zeros((pad_len, inputs.shape[1], inputs.shape[2]),
                           dtype=inputs.dtype)
        inputs = jnp.concatenate([inputs, zeros_], axis=0)
    else:
        dilated_steps = n_steps // rate
    return inputs, dilated_steps


def _prepare_inputs(inputs, rate):
    # cat([inputs[j::rate] for j in range(rate)], dim=1)
    return jnp.concatenate([inputs[j::rate, :, :] for j in range(rate)], axis=1)


def _split_outputs(dilated_outputs, rate):
    batchsize = dilated_outputs.shape[1] // rate
    blocks = [dilated_outputs[:, i * batchsize:(i + 1) * batchsize, :]
              for i in range(rate)]
    interleaved = jnp.stack(blocks, axis=0)              # (rate, Td, B, H)
    interleaved = jnp.swapaxes(interleaved, 0, 1)        # (Td, rate, B, H)
    return interleaved.reshape(dilated_outputs.shape[0] * rate,
                               batchsize, dilated_outputs.shape[2])


def drnn_layer(params, inputs, rate, layer_fn=gru_layer_pallas):
    n_steps = inputs.shape[0]
    padded, _ = _pad_inputs(inputs, n_steps, rate)
    dilated_inputs = _prepare_inputs(padded, rate)
    dilated_outputs, hidden = layer_fn(
        dilated_inputs, params["w_ih"], params["w_hh"],
        params["b_ih"], params["b_hh"])
    splitted = _split_outputs(dilated_outputs, rate)
    outputs = splitted[:n_steps]
    return outputs, hidden


def multi_drnn_forward(layer_params, dilations, inputs, batch_first=False,
                       layer_fn=gru_layer_pallas):
    """Forward pass of multi_dRNN_with_dilations (cell_type='GRU')."""
    if batch_first:
        inputs = jnp.swapaxes(inputs, 0, 1)
    last_steps = []
    for params, dilation in zip(layer_params, dilations):
        inputs, _ = drnn_layer(params, inputs, dilation, layer_fn=layer_fn)
        last_steps.append(inputs[-1:])
    if batch_first:
        inputs = jnp.swapaxes(inputs, 0, 1)
    return inputs, last_steps


# ----------------------------------------------------------------------------
# Deterministic parameter construction (PyTorch nn.GRU default-style init)
# ----------------------------------------------------------------------------
def make_gru_params(key, input_dim, hidden_dim):
    k = 1.0 / jnp.sqrt(hidden_dim)
    k1, k2, k3, k4 = jax.random.split(key, 4)
    return {
        "w_ih": jax.random.uniform(k1, (3 * hidden_dim, input_dim),
                                   jnp.float32, -k, k),
        "w_hh": jax.random.uniform(k2, (3 * hidden_dim, hidden_dim),
                                   jnp.float32, -k, k),
        "b_ih": jax.random.uniform(k3, (3 * hidden_dim,), jnp.float32, -k, k),
        "b_hh": jax.random.uniform(k4, (3 * hidden_dim,), jnp.float32, -k, k),
    }


# ----------------------------------------------------------------------------
# Pure-JAX reference GRU layer (sanity check of the kernel + full forward)
# ----------------------------------------------------------------------------
def gru_layer_ref(x_dil, w_ih, w_hh, b_ih, b_hh):
    H = w_hh.shape[1]
    wih_t, whh_t = w_ih.T, w_hh.T

    def step(h, x):
        gi = jnp.dot(x, wih_t, precision=_HIGHEST) + b_ih
        gh = jnp.dot(h, whh_t, precision=_HIGHEST) + b_hh
        i_r, i_z, i_n = gi[:, :H], gi[:, H:2 * H], gi[:, 2 * H:]
        h_r, h_z, h_n = gh[:, :H], gh[:, H:2 * H], gh[:, 2 * H:]
        r = jax.nn.sigmoid(i_r + h_r)
        z = jax.nn.sigmoid(i_z + h_z)
        n = jnp.tanh(i_n + r * h_n)
        h_new = (1.0 - z) * n + z * h
        return h_new, h_new

    h0 = jnp.zeros((x_dil.shape[1], H), jnp.float32)
    _, ys = lax.scan(step, h0, x_dil.astype(jnp.float32))
    return ys, ys[-1]


if __name__ == "__main__":
    # Module config: cell_type='GRU', batch_first=False
    hidden_structs = [32, 32, 32]
    dilations = [1, 2, 4]
    input_dims = 4
    seq_len, batch = 8, 2

    key = jax.random.PRNGKey(0)
    key, kx = jax.random.split(key)
    # inputs layout: (seq_len, batch, input_dims)  (time-major, batch_first=False)
    x = jax.random.normal(kx, (seq_len, batch, input_dims), jnp.float32)

    layer_params = []
    in_dim = input_dims
    for h in hidden_structs:
        key, kp = jax.random.split(key)
        layer_params.append(make_gru_params(kp, in_dim, h))
        in_dim = h

    # Pallas forward
    final_out, last_steps = multi_drnn_forward(layer_params, dilations, x)
    final_out = jax.block_until_ready(final_out)
    last_steps = [jax.block_until_ready(o) for o in last_steps]

    assert final_out.shape == (seq_len, batch, hidden_structs[-1])
    for o, h in zip(last_steps, hidden_structs):
        assert o.shape == (1, batch, h)

    # Pure-JAX reference forward (same plumbing, scan-based GRU cell)
    ref_out, ref_last = multi_drnn_forward(layer_params, dilations, x,
                                           layer_fn=gru_layer_ref)
    ref_out = jax.block_until_ready(ref_out)

    assert jnp.allclose(final_out, ref_out, atol=1e-4, rtol=1e-4), \
        "multi-layer forward mismatch"
    for ok, rk in zip(last_steps, ref_last):
        assert jnp.allclose(ok, rk, atol=1e-4, rtol=1e-4), "last-step mismatch"

    # Direct layer-0 kernel check (rate 1 -> no dilation plumbing involved).
    p0 = layer_params[0]
    out_k, _ = gru_layer_pallas(x, p0["w_ih"], p0["w_hh"], p0["b_ih"], p0["b_hh"])
    out_r, _ = gru_layer_ref(x, p0["w_ih"], p0["w_hh"], p0["b_ih"], p0["b_hh"])
    assert jnp.allclose(out_k, out_r, atol=1e-4, rtol=1e-4), "kernel mismatch"

    print("KERNEL_OK")
</pallas_src>

<mosaic_0001>
module attributes {stable_mosaic.version = 11 : i64} {
  func.func @_gru_layer_kernel(%arg0: i32, %arg1: memref<64x4xf32, #tpu.memory_space<vmem>>, %arg2: memref<4x32xf32, #tpu.memory_space<vmem>>, %arg3: memref<4x32xf32, #tpu.memory_space<vmem>>, %arg4: memref<4x32xf32, #tpu.memory_space<vmem>>, %arg5: memref<32x32xf32, #tpu.memory_space<vmem>>, %arg6: memref<32x32xf32, #tpu.memory_space<vmem>>, %arg7: memref<32x32xf32, #tpu.memory_space<vmem>>, %arg8: memref<1x32xf32, #tpu.memory_space<vmem>>, %arg9: memref<1x32xf32, #tpu.memory_space<vmem>>, %arg10: memref<1x32xf32, #tpu.memory_space<vmem>>, %arg11: memref<1x32xf32, #tpu.memory_space<vmem>>, %arg12: memref<64x32xf32, #tpu.memory_space<vmem>>, %arg13: memref<64x32xf32, #tpu.memory_space<vmem>>, %arg14: memref<64x32xf32, #tpu.memory_space<vmem>>, %arg15: memref<64x32xf32, #tpu.memory_space<vmem>>, %arg16: memref<8x32xf32, #tpu.memory_space<vmem>>) attributes {dimension_semantics = [#tpu.dimension_semantics<arbitrary>], iteration_bounds = array<i64: 1>, scalar_prefetch = 0 : i64, scratch_operands = 4 : i64, tpu.core_type = #tpu.core_type<tc>, window_params = [{transform_indices = @transform_0, window_bounds = array<i64: 64, 4>}, {pipeline_mode = #tpu.pipeline_mode<synchronous>, transform_indices = @transform_1, window_bounds = array<i64: 4, 32>}, {pipeline_mode = #tpu.pipeline_mode<synchronous>, transform_indices = @transform_2, window_bounds = array<i64: 4, 32>}, {pipeline_mode = #tpu.pipeline_mode<synchronous>, transform_indices = @transform_3, window_bounds = array<i64: 4, 32>}, {pipeline_mode = #tpu.pipeline_mode<synchronous>, transform_indices = @transform_4, window_bounds = array<i64: 32, 32>}, {pipeline_mode = #tpu.pipeline_mode<synchronous>, transform_indices = @transform_5, window_bounds = array<i64: 32, 32>}, {pipeline_mode = #tpu.pipeline_mode<synchronous>, transform_indices = @transform_6, window_bounds = array<i64: 32, 32>}, {pipeline_mode = #tpu.pipeline_mode<synchronous>, transform_indices = @transform_7, window_bounds = array<i64: 1, 32>}, {pipeline_mode = #tpu.pipeline_mode<synchronous>, transform_indices = @transform_8, window_bounds = array<i64: 1, 32>}, {pipeline_mode = #tpu.pipeline_mode<synchronous>, transform_indices = @transform_9, window_bounds = array<i64: 1, 32>}, {pipeline_mode = #tpu.pipeline_mode<synchronous>, transform_indices = @transform_10, window_bounds = array<i64: 1, 32>}, {transform_indices = @transform_11, window_bounds = array<i64: 64, 32>}]} {
    %c0_i32 = arith.constant 0 : i32
    %0 = arith.cmpi eq, %arg0, %c0_i32 : i32
    %1 = arith.extui %0 : i1 to i32
    %c0_i32_0 = arith.constant 0 : i32
    %2 = arith.cmpi ne, %1, %c0_i32_0 : i32
    scf.if %2 {
      %cst_115 = arith.constant 0.000000e+00 : f32
      %292 = vector.broadcast %cst_115 : f32 to vector<8x32xf32>
      %c0_116 = arith.constant 0 : index
      %c0_117 = arith.constant 0 : index
      %293 = vector.load %arg16[%c0_116, %c0_117] : memref<8x32xf32, #tpu.memory_space<vmem>>, vector<8x32xf32>
      tpu.vector_store %arg16[%c0_116, %c0_117], %292 {strides = array<i32>} : memref<8x32xf32, #tpu.memory_space<vmem>>, vector<8x32xf32>,
    } else {
    }
    %c0 = arith.constant 0 : index
    %c0_1 = arith.constant 0 : index
    %3 = vector.load %arg1[%c0, %c0_1] : memref<64x4xf32, #tpu.memory_space<vmem>>, vector<64x4xf32>
    %c0_2 = arith.constant 0 : index
    %c0_3 = arith.constant 0 : index
    %4 = vector.load %arg2[%c0_2, %c0_3] : memref<4x32xf32, #tpu.memory_space<vmem>>, vector<4x32xf32>
    %cst = arith.constant dense<0.000000e+00> : vector<64x32xf32>
    %5 = tpu.matmul %3, %4, %cst {dimension_numbers = #tpu.dot_dimension_numbers<[1], [0], [0], [1], [0, 0, 1, 1], [], []>} : vector<64x4xf32>, vector<4x32xf32>, vector<64x32xf32> -> vector<64x32xf32>
    %c0_4 = arith.constant 0 : index
    %c0_5 = arith.constant 0 : index
    %6 = vector.load %arg8[%c0_4, %c0_5] : memref<1x32xf32, #tpu.memory_space<vmem>>, vector<1x32xf32>
    %7 = vector.broadcast %6 : vector<1x32xf32> to vector<64x32xf32>
    %8 = arith.addf %5, %7 : vector<64x32xf32>
    %c0_6 = arith.constant 0 : index
    %c0_7 = arith.constant 0 : index
    %9 = vector.load %arg13[%c0_6, %c0_7] : memref<64x32xf32, #tpu.memory_space<vmem>>, vector<64x32xf32>
    tpu.vector_store %arg13[%c0_6, %c0_7], %8 {strides = array<i32>} : memref<64x32xf32, #tpu.memory_space<vmem>>, vector<64x32xf32>,
    %c0_8 = arith.constant 0 : index
    %c0_9 = arith.constant 0 : index
    %10 = vector.load %arg3[%c0_8, %c0_9] : memref<4x32xf32, #tpu.memory_space<vmem>>, vector<4x32xf32>
    %cst_10 = arith.constant dense<0.000000e+00> : vector<64x32xf32>
    %11 = tpu.matmul %3, %10, %cst_10 {dimension_numbers = #tpu.dot_dimension_numbers<[1], [0], [0], [1], [0, 0, 1, 1], [], []>} : vector<64x4xf32>, vector<4x32xf32>, vector<64x32xf32> -> vector<64x32xf32>
    %c0_11 = arith.constant 0 : index
    %c0_12 = arith.constant 0 : index
    %12 = vector.load %arg9[%c0_11, %c0_12] : memref<1x32xf32, #tpu.memory_space<vmem>>, vector<1x32xf32>
    %13 = vector.broadcast %12 : vector<1x32xf32> to vector<64x32xf32>
    %14 = arith.addf %11, %13 : vector<64x32xf32>
    %c0_13 = arith.constant 0 : index
    %c0_14 = arith.constant 0 : index
    %15 = vector.load %arg14[%c0_13, %c0_14] : memref<64x32xf32, #tpu.memory_space<vmem>>, vector<64x32xf32>
    tpu.vector_store %arg14[%c0_13, %c0_14], %14 {strides = array<i32>} : memref<64x32xf32, #tpu.memory_space<vmem>>, vector<64x32xf32>,
    %c0_15 = arith.constant 0 : index
    %c0_16 = arith.constant 0 : index
    %16 = vector.load %arg4[%c0_15, %c0_16] : memref<4x32xf32, #tpu.memory_space<vmem>>, vector<4x32xf32>
    %cst_17 = arith.constant dense<0.000000e+00> : vector<64x32xf32>
    %17 = tpu.matmul %3, %16, %cst_17 {dimension_numbers = #tpu.dot_dimension_numbers<[1], [0], [0], [1], [0, 0, 1, 1], [], []>} : vector<64x4xf32>, vector<4x32xf32>, vector<64x32xf32> -> vector<64x32xf32>
    %c0_18 = arith.constant 0 : index
    %c0_19 = arith.constant 0 : index
    %18 = vector.load %arg10[%c0_18, %c0_19] : memref<1x32xf32, #tpu.memory_space<vmem>>, vector<1x32xf32>
    %19 = vector.broadcast %18 : vector<1x32xf32> to vector<64x32xf32>
    %20 = arith.addf %17, %19 : vector<64x32xf32>
    %c0_20 = arith.constant 0 : index
    %c0_21 = arith.constant 0 : index
    %21 = vector.load %arg15[%c0_20, %c0_21] : memref<64x32xf32, #tpu.memory_space<vmem>>, vector<64x32xf32>
    tpu.vector_store %arg15[%c0_20, %c0_21], %20 {strides = array<i32>} : memref<64x32xf32, #tpu.memory_space<vmem>>, vector<64x32xf32>,
    %c0_22 = arith.constant 0 : index
    %c0_23 = arith.constant 0 : index
    %22 = vector.load %arg5[%c0_22, %c0_23] : memref<32x32xf32, #tpu.memory_space<vmem>>, vector<32x32xf32>
    %c0_24 = arith.constant 0 : index
    %c0_25 = arith.constant 0 : index
    %23 = vector.load %arg6[%c0_24, %c0_25] : memref<32x32xf32, #tpu.memory_space<vmem>>, vector<32x32xf32>
    %c0_26 = arith.constant 0 : index
    %c0_27 = arith.constant 0 : index
    %24 = vector.load %arg7[%c0_26, %c0_27] : memref<32x32xf32, #tpu.memory_space<vmem>>, vector<32x32xf32>
    %c0_28 = arith.constant 0 : index
    %c0_29 = arith.constant 0 : index
    %25 = vector.load %arg11[%c0_28, %c0_29] : memref<1x32xf32, #tpu.memory_space<vmem>>, vector<1x32xf32>
    %c0_30 = arith.constant 0 : index
    %c0_31 = arith.constant 0 : index
    %26 = vector.load %arg16[%c0_30, %c0_31] : memref<8x32xf32, #tpu.memory_space<vmem>>, vector<8x32xf32>
    %c0_i32_32 = arith.constant 0 : i32
    %c8_i32 = arith.constant 8 : i32
    %27 = arith.muli %c0_i32_32, %c8_i32 : i32
    %28 = tpu.assume_multiple %27, 8 : i32
    %cst_33 = arith.constant dense<0.000000e+00> : vector<8x32xf32>
    %29 = tpu.matmul %26, %22, %cst_33 {dimension_numbers = #tpu.dot_dimension_numbers<[1], [0], [0], [1], [0, 0, 1, 1], [], []>} : vector<8x32xf32>, vector<32x32xf32>, vector<8x32xf32> -> vector<8x32xf32>
    %cst_34 = arith.constant dense<0.000000e+00> : vector<8x32xf32>
    %30 = tpu.matmul %26, %23, %cst_34 {dimension_numbers = #tpu.dot_dimension_numbers<[1], [0], [0], [1], [0, 0, 1, 1], [], []>} : vector<8x32xf32>, vector<32x32xf32>, vector<8x32xf32> -> vector<8x32xf32>
    %cst_35 = arith.constant dense<0.000000e+00> : vector<8x32xf32>
    %31 = tpu.matmul %26, %24, %cst_35 {dimension_numbers = #tpu.dot_dimension_numbers<[1], [0], [0], [1], [0, 0, 1, 1], [], []>} : vector<8x32xf32>, vector<32x32xf32>, vector<8x32xf32> -> vector<8x32xf32>
    %32 = arith.index_cast %28 : i32 to index
    %c0_36 = arith.constant 0 : index
    %33 = vector.load %arg13[%32, %c0_36] : memref<64x32xf32, #tpu.memory_space<vmem>>, vector<8x32xf32>
    %34 = arith.addf %33, %29 : vector<8x32xf32>
    %35 = arith.negf %34 : vector<8x32xf32>
    %36 = math.exp %35 : vector<8x32xf32>
    %cst_37 = arith.constant 1.000000e+00 : f32
    %37 = vector.broadcast %cst_37 : f32 to vector<8x32xf32>
    %38 = arith.addf %37, %36 : vector<8x32xf32>
    %39 = arith.divf %37, %38 : vector<8x32xf32>
    %40 = arith.index_cast %28 : i32 to index
    %c0_38 = arith.constant 0 : index
    %41 = vector.load %arg14[%40, %c0_38] : memref<64x32xf32, #tpu.memory_space<vmem>>, vector<8x32xf32>
    %42 = arith.addf %41, %30 : vector<8x32xf32>
    %43 = arith.negf %42 : vector<8x32xf32>
    %44 = math.exp %43 : vector<8x32xf32>
    %cst_39 = arith.constant 1.000000e+00 : f32
    %45 = vector.broadcast %cst_39 : f32 to vector<8x32xf32>
    %46 = arith.addf %45, %44 : vector<8x32xf32>
    %47 = arith.divf %45, %46 : vector<8x32xf32>
    %48 = arith.index_cast %28 : i32 to index
    %c0_40 = arith.constant 0 : index
    %49 = vector.load %arg15[%48, %c0_40] : memref<64x32xf32, #tpu.memory_space<vmem>>, vector<8x32xf32>
    %50 = vector.broadcast %25 : vector<1x32xf32> to vector<8x32xf32>
    %51 = arith.addf %31, %50 : vector<8x32xf32>
    %52 = arith.mulf %39, %51 : vector<8x32xf32>
    %53 = arith.addf %49, %52 : vector<8x32xf32>
    %54 = math.tanh %53 : vector<8x32xf32>
    %55 = arith.subf %26, %54 : vector<8x32xf32>
    %56 = arith.mulf %47, %55 : vector<8x32xf32>
    %57 = arith.addf %54, %56 : vector<8x32xf32>
    %58 = arith.index_cast %28 : i32 to index
    %c0_41 = arith.constant 0 : index
    %59 = vector.load %arg12[%58, %c0_41] : memref<64x32xf32, #tpu.memory_space<vmem>>, vector<8x32xf32>
    tpu.vector_store %arg12[%58, %c0_41], %57 {strides = array<i32>} : memref<64x32xf32, #tpu.memory_space<vmem>>, vector<8x32xf32>,
    %c1_i32 = arith.constant 1 : i32
    %c8_i32_42 = arith.constant 8 : i32
    %60 = arith.muli %c1_i32, %c8_i32_42 : i32
    %61 = tpu.assume_multiple %60, 8 : i32
    %cst_43 = arith.constant dense<0.000000e+00> : vector<8x32xf32>
    %62 = tpu.matmul %57, %22, %cst_43 {dimension_numbers = #tpu.dot_dimension_numbers<[1], [0], [0], [1], [0, 0, 1, 1], [], []>} : vector<8x32xf32>, vector<32x32xf32>, vector<8x32xf32> -> vector<8x32xf32>
    %cst_44 = arith.constant dense<0.000000e+00> : vector<8x32xf32>
    %63 = tpu.matmul %57, %23, %cst_44 {dimension_numbers = #tpu.dot_dimension_numbers<[1], [0], [0], [1], [0, 0, 1, 1], [], []>} : vector<8x32xf32>, vector<32x32xf32>, vector<8x32xf32> -> vector<8x32xf32>
    %cst_45 = arith.constant dense<0.000000e+00> : vector<8x32xf32>
    %64 = tpu.matmul %57, %24, %cst_45 {dimension_numbers = #tpu.dot_dimension_numbers<[1], [0], [0], [1], [0, 0, 1, 1], [], []>} : vector<8x32xf32>, vector<32x32xf32>, vector<8x32xf32> -> vector<8x32xf32>
    %65 = arith.index_cast %61 : i32 to index
    %c0_46 = arith.constant 0 : index
    %66 = vector.load %arg13[%65, %c0_46] : memref<64x32xf32, #tpu.memory_space<vmem>>, vector<8x32xf32>
    %67 = arith.addf %66, %62 : vector<8x32xf32>
    %68 = arith.negf %67 : vector<8x32xf32>
    %69 = math.exp %68 : vector<8x32xf32>
    %cst_47 = arith.constant 1.000000e+00 : f32
    %70 = vector.broadcast %cst_47 : f32 to vector<8x32xf32>
    %71 = arith.addf %70, %69 : vector<8x32xf32>
    %72 = arith.divf %70, %71 : vector<8x32xf32>
    %73 = arith.index_cast %61 : i32 to index
    %c0_48 = arith.constant 0 : index
    %74 = vector.load %arg14[%73, %c0_48] : memref<64x32xf32, #tpu.memory_space<vmem>>, vector<8x32xf32>
    %75 = arith.addf %74, %63 : vector<8x32xf32>
    %76 = arith.negf %75 : vector<8x32xf32>
    %77 = math.exp %76 : vector<8x32xf32>
    %cst_49 = arith.constant 1.000000e+00 : f32
    %78 = vector.broadcast %cst_49 : f32 to vector<8x32xf32>
    %79 = arith.addf %78, %77 : vector<8x32xf32>
    %80 = arith.divf %78, %79 : vector<8x32xf32>
    %81 = arith.index_cast %61 : i32 to index
    %c0_50 = arith.constant 0 : index
    %82 = vector.load %arg15[%81, %c0_50] : memref<64x32xf32, #tpu.memory_space<vmem>>, vector<8x32xf32>
    %83 = vector.broadcast %25 : vector<1x32xf32> to vector<8x32xf32>
    %84 = arith.addf %64, %83 : vector<8x32xf32>
    %85 = arith.mulf %72, %84 : vector<8x32xf32>
    %86 = arith.addf %82, %85 : vector<8x32xf32>
    %87 = math.tanh %86 : vector<8x32xf32>
    %88 = arith.subf %57, %87 : vector<8x32xf32>
    %89 = arith.mulf %80, %88 : vector<8x32xf32>
    %90 = arith.addf %87, %89 : vector<8x32xf32>
    %91 = arith.index_cast %61 : i32 to index
    %c0_51 = arith.constant 0 : index
    %92 = vector.load %arg12[%91, %c0_51] : memref<64x32xf32, #tpu.memory_space<vmem>>, vector<8x32xf32>
    tpu.vector_store %arg12[%91, %c0_51], %90 {strides = array<i32>} : memref<64x32xf32, #tpu.memory_space<vmem>>, vector<8x32xf32>,
    %c2_i32 = arith.constant 2 : i32
    %c8_i32_52 = arith.constant 8 : i32
    %93 = arith.muli %c2_i32, %c8_i32_52 : i32
    %94 = tpu.assume_multiple %93, 8 : i32
    %cst_53 = arith.constant dense<0.000000e+00> : vector<8x32xf32>
    %95 = tpu.matmul %90, %22, %cst_53 {dimension_numbers = #tpu.dot_dimension_numbers<[1], [0], [0], [1], [0, 0, 1, 1], [], []>} : vector<8x32xf32>, vector<32x32xf32>, vector<8x32xf32> -> vector<8x32xf32>
    %cst_54 = arith.constant dense<0.000000e+00> : vector<8x32xf32>
    %96 = tpu.matmul %90, %23, %cst_54 {dimension_numbers = #tpu.dot_dimension_numbers<[1], [0], [0], [1], [0, 0, 1, 1], [], []>} : vector<8x32xf32>, vector<32x32xf32>, vector<8x32xf32> -> vector<8x32xf32>
    %cst_55 = arith.constant dense<0.000000e+00> : vector<8x32xf32>
    %97 = tpu.matmul %90, %24, %cst_55 {dimension_numbers = #tpu.dot_dimension_numbers<[1], [0], [0], [1], [0, 0, 1, 1], [], []>} : vector<8x32xf32>, vector<32x32xf32>, vector<8x32xf32> -> vector<8x32xf32>
    %98 = arith.index_cast %94 : i32 to index
    %c0_56 = arith.constant 0 : index
    %99 = vector.load %arg13[%98, %c0_56] : memref<64x32xf32, #tpu.memory_space<vmem>>, vector<8x32xf32>
    %100 = arith.addf %99, %95 : vector<8x32xf32>
    %101 = arith.negf %100 : vector<8x32xf32>
    %102 = math.exp %101 : vector<8x32xf32>
    %cst_57 = arith.constant 1.000000e+00 : f32
    %103 = vector.broadcast %cst_57 : f32 to vector<8x32xf32>
    %104 = arith.addf %103, %102 : vector<8x32xf32>
    %105 = arith.divf %103, %104 : vector<8x32xf32>
    %106 = arith.index_cast %94 : i32 to index
    %c0_58 = arith.constant 0 : index
    %107 = vector.load %arg14[%106, %c0_58] : memref<64x32xf32, #tpu.memory_space<vmem>>, vector<8x32xf32>
    %108 = arith.addf %107, %96 : vector<8x32xf32>
    %109 = arith.negf %108 : vector<8x32xf32>
    %110 = math.exp %109 : vector<8x32xf32>
    %cst_59 = arith.constant 1.000000e+00 : f32
    %111 = vector.broadcast %cst_59 : f32 to vector<8x32xf32>
    %112 = arith.addf %111, %110 : vector<8x32xf32>
    %113 = arith.divf %111, %112 : vector<8x32xf32>
    %114 = arith.index_cast %94 : i32 to index
    %c0_60 = arith.constant 0 : index
    %115 = vector.load %arg15[%114, %c0_60] : memref<64x32xf32, #tpu.memory_space<vmem>>, vector<8x32xf32>
    %116 = vector.broadcast %25 : vector<1x32xf32> to vector<8x32xf32>
    %117 = arith.addf %97, %116 : vector<8x32xf32>
    %118 = arith.mulf %105, %117 : vector<8x32xf32>
    %119 = arith.addf %115, %118 : vector<8x32xf32>
    %120 = math.tanh %119 : vector<8x32xf32>
    %121 = arith.subf %90, %120 : vector<8x32xf32>
    %122 = arith.mulf %113, %121 : vector<8x32xf32>
    %123 = arith.addf %120, %122 : vector<8x32xf32>
    %124 = arith.index_cast %94 : i32 to index
    %c0_61 = arith.constant 0 : index
    %125 = vector.load %arg12[%124, %c0_61] : memref<64x32xf32, #tpu.memory_space<vmem>>, vector<8x32xf32>
    tpu.vector_store %arg12[%124, %c0_61], %123 {strides = array<i32>} : memref<64x32xf32, #tpu.memory_space<vmem>>, vector<8x32xf32>,
    %c3_i32 = arith.constant 3 : i32
    %c8_i32_62 = arith.constant 8 : i32
    %126 = arith.muli %c3_i32, %c8_i32_62 : i32
    %127 = tpu.assume_multiple %126, 8 : i32
    %cst_63 = arith.constant dense<0.000000e+00> : vector<8x32xf32>
    %128 = tpu.matmul %123, %22, %cst_63 {dimension_numbers = #tpu.dot_dimension_numbers<[1], [0], [0], [1], [0, 0, 1, 1], [], []>} : vector<8x32xf32>, vector<32x32xf32>, vector<8x32xf32> -> vector<8x32xf32>
    %cst_64 = arith.constant dense<0.000000e+00> : vector<8x32xf32>
    %129 = tpu.matmul %123, %23, %cst_64 {dimension_numbers = #tpu.dot_dimension_numbers<[1], [0], [0], [1], [0, 0, 1, 1], [], []>} : vector<8x32xf32>, vector<32x32xf32>, vector<8x32xf32> -> vector<8x32xf32>
    %cst_65 = arith.constant dense<0.000000e+00> : vector<8x32xf32>
    %130 = tpu.matmul %123, %24, %cst_65 {dimension_numbers = #tpu.dot_dimension_numbers<[1], [0], [0], [1], [0, 0, 1, 1], [], []>} : vector<8x32xf32>, vector<32x32xf32>, vector<8x32xf32> -> vector<8x32xf32>
    %131 = arith.index_cast %127 : i32 to index
    %c0_66 = arith.constant 0 : index
    %132 = vector.load %arg13[%131, %c0_66] : memref<64x32xf32, #tpu.memory_space<vmem>>, vector<8x32xf32>
    %133 = arith.addf %132, %128 : vector<8x32xf32>
    %134 = arith.negf %133 : vector<8x32xf32>
    %135 = math.exp %134 : vector<8x32xf32>
    %cst_67 = arith.constant 1.000000e+00 : f32
    %136 = vector.broadcast %cst_67 : f32 to vector<8x32xf32>
    %137 = arith.addf %136, %135 : vector<8x32xf32>
    %138 = arith.divf %136, %137 : vector<8x32xf32>
    %139 = arith.index_cast %127 : i32 to index
    %c0_68 = arith.constant 0 : index
    %140 = vector.load %arg14[%139, %c0_68] : memref<64x32xf32, #tpu.memory_space<vmem>>, vector<8x32xf32>
    %141 = arith.addf %140, %129 : vector<8x32xf32>
    %142 = arith.negf %141 : vector<8x32xf32>
    %143 = math.exp %142 : vector<8x32xf32>
    %cst_69 = arith.constant 1.000000e+00 : f32
    %144 = vector.broadcast %cst_69 : f32 to vector<8x32xf32>
    %145 = arith.addf %144, %143 : vector<8x32xf32>
    %146 = arith.divf %144, %145 : vector<8x32xf32>
    %147 = arith.index_cast %127 : i32 to index
    %c0_70 = arith.constant 0 : index
    %148 = vector.load %arg15[%147, %c0_70] : memref<64x32xf32, #tpu.memory_space<vmem>>, vector<8x32xf32>
    %149 = vector.broadcast %25 : vector<1x32xf32> to vector<8x32xf32>
    %150 = arith.addf %130, %149 : vector<8x32xf32>
    %151 = arith.mulf %138, %150 : vector<8x32xf32>
    %152 = arith.addf %148, %151 : vector<8x32xf32>
    %153 = math.tanh %152 : vector<8x32xf32>
    %154 = arith.subf %123, %153 : vector<8x32xf32>
    %155 = arith.mulf %146, %154 : vector<8x32xf32>
    %156 = arith.addf %153, %155 : vector<8x32xf32>
    %157 = arith.index_cast %127 : i32 to index
    %c0_71 = arith.constant 0 : index
    %158 = vector.load %arg12[%157, %c0_71] : memref<64x32xf32, #tpu.memory_space<vmem>>, vector<8x32xf32>
    tpu.vector_store %arg12[%157, %c0_71], %156 {strides = array<i32>} : memref<64x32xf32, #tpu.memory_space<vmem>>, vector<8x32xf32>,
    %c4_i32 = arith.constant 4 : i32
    %c8_i32_72 = arith.constant 8 : i32
    %159 = arith.muli %c4_i32, %c8_i32_72 : i32
    %160 = tpu.assume_multiple %159, 8 : i32
    %cst_73 = arith.constant dense<0.000000e+00> : vector<8x32xf32>
    %161 = tpu.matmul %156, %22, %cst_73 {dimension_numbers = #tpu.dot_dimension_numbers<[1], [0], [0], [1], [0, 0, 1, 1], [], []>} : vector<8x32xf32>, vector<32x32xf32>, vector<8x32xf32> -> vector<8x32xf32>
    %cst_74 = arith.constant dense<0.000000e+00> : vector<8x32xf32>
    %162 = tpu.matmul %156, %23, %cst_74 {dimension_numbers = #tpu.dot_dimension_numbers<[1], [0], [0], [1], [0, 0, 1, 1], [], []>} : vector<8x32xf32>, vector<32x32xf32>, vector<8x32xf32> -> vector<8x32xf32>
    %cst_75 = arith.constant dense<0.000000e+00> : vector<8x32xf32>
    %163 = tpu.matmul %156, %24, %cst_75 {dimension_numbers = #tpu.dot_dimension_numbers<[1], [0], [0], [1], [0, 0, 1, 1], [], []>} : vector<8x32xf32>, vector<32x32xf32>, vector<8x32xf32> -> vector<8x32xf32>
    %164 = arith.index_cast %160 : i32 to index
    %c0_76 = arith.constant 0 : index
    %165 = vector.load %arg13[%164, %c0_76] : memref<64x32xf32, #tpu.memory_space<vmem>>, vector<8x32xf32>
    %166 = arith.addf %165, %161 : vector<8x32xf32>
    %167 = arith.negf %166 : vector<8x32xf32>
    %168 = math.exp %167 : vector<8x32xf32>
    %cst_77 = arith.constant 1.000000e+00 : f32
    %169 = vector.broadcast %cst_77 : f32 to vector<8x32xf32>
    %170 = arith.addf %169, %168 : vector<8x32xf32>
    %171 = arith.divf %169, %170 : vector<8x32xf32>
    %172 = arith.index_cast %160 : i32 to index
    %c0_78 = arith.constant 0 : index
    %173 = vector.load %arg14[%172, %c0_78] : memref<64x32xf32, #tpu.memory_space<vmem>>, vector<8x32xf32>
    %174 = arith.addf %173, %162 : vector<8x32xf32>
    %175 = arith.negf %174 : vector<8x32xf32>
    %176 = math.exp %175 : vector<8x32xf32>
    %cst_79 = arith.constant 1.000000e+00 : f32
    %177 = vector.broadcast %cst_79 : f32 to vector<8x32xf32>
    %178 = arith.addf %177, %176 : vector<8x32xf32>
    %179 = arith.divf %177, %178 : vector<8x32xf32>
    %180 = arith.index_cast %160 : i32 to index
    %c0_80 = arith.constant 0 : index
    %181 = vector.load %arg15[%180, %c0_80] : memref<64x32xf32, #tpu.memory_space<vmem>>, vector<8x32xf32>
    %182 = vector.broadcast %25 : vector<1x32xf32> to vector<8x32xf32>
    %183 = arith.addf %163, %182 : vector<8x32xf32>
    %184 = arith.mulf %171, %183 : vector<8x32xf32>
    %185 = arith.addf %181, %184 : vector<8x32xf32>
    %186 = math.tanh %185 : vector<8x32xf32>
    %187 = arith.subf %156, %186 : vector<8x32xf32>
    %188 = arith.mulf %179, %187 : vector<8x32xf32>
    %189 = arith.addf %186, %188 : vector<8x32xf32>
    %190 = arith.index_cast %160 : i32 to index
    %c0_81 = arith.constant 0 : index
    %191 = vector.load %arg12[%190, %c0_81] : memref<64x32xf32, #tpu.memory_space<vmem>>, vector<8x32xf32>
    tpu.vector_store %arg12[%190, %c0_81], %189 {strides = array<i32>} : memref<64x32xf32, #tpu.memory_space<vmem>>, vector<8x32xf32>,
    %c5_i32 = arith.constant 5 : i32
    %c8_i32_82 = arith.constant 8 : i32
    %192 = arith.muli %c5_i32, %c8_i32_82 : i32
    %193 = tpu.assume_multiple %192, 8 : i32
    %cst_83 = arith.constant dense<0.000000e+00> : vector<8x32xf32>
    %194 = tpu.matmul %189, %22, %cst_83 {dimension_numbers = #tpu.dot_dimension_numbers<[1], [0], [0], [1], [0, 0, 1, 1], [], []>} : vector<8x32xf32>, vector<32x32xf32>, vector<8x32xf32> -> vector<8x32xf32>
    %cst_84 = arith.constant dense<0.000000e+00> : vector<8x32xf32>
    %195 = tpu.matmul %189, %23, %cst_84 {dimension_numbers = #tpu.dot_dimension_numbers<[1], [0], [0], [1], [0, 0, 1, 1], [], []>} : vector<8x32xf32>, vector<32x32xf32>, vector<8x32xf32> -> vector<8x32xf32>
    %cst_85 = arith.constant dense<0.000000e+00> : vector<8x32xf32>
    %196 = tpu.matmul %189, %24, %cst_85 {dimension_numbers = #tpu.dot_dimension_numbers<[1], [0], [0], [1], [0, 0, 1, 1], [], []>} : vector<8x32xf32>, vector<32x32xf32>, vector<8x32xf32> -> vector<8x32xf32>
    %197 = arith.index_cast %193 : i32 to index
    %c0_86 = arith.constant 0 : index
    %198 = vector.load %arg13[%197, %c0_86] : memref<64x32xf32, #tpu.memory_space<vmem>>, vector<8x32xf32>
    %199 = arith.addf %198, %194 : vector<8x32xf32>
    %200 = arith.negf %199 : vector<8x32xf32>
    %201 = math.exp %200 : vector<8x32xf32>
    %cst_87 = arith.constant 1.000000e+00 : f32
    %202 = vector.broadcast %cst_87 : f32 to vector<8x32xf32>
    %203 = arith.addf %202, %201 : vector<8x32xf32>
    %204 = arith.divf %202, %203 : vector<8x32xf32>
    %205 = arith.index_cast %193 : i32 to index
    %c0_88 = arith.constant 0 : index
    %206 = vector.load %arg14[%205, %c0_88] : memref<64x32xf32, #tpu.memory_space<vmem>>, vector<8x32xf32>
    %207 = arith.addf %206, %195 : vector<8x32xf32>
    %208 = arith.negf %207 : vector<8x32xf32>
    %209 = math.exp %208 : vector<8x32xf32>
    %cst_89 = arith.constant 1.000000e+00 : f32
    %210 = vector.broadcast %cst_89 : f32 to vector<8x32xf32>
    %211 = arith.addf %210, %209 : vector<8x32xf32>
    %212 = arith.divf %210, %211 : vector<8x32xf32>
    %213 = arith.index_cast %193 : i32 to index
    %c0_90 = arith.constant 0 : index
    %214 = vector.load %arg15[%213, %c0_90] : memref<64x32xf32, #tpu.memory_space<vmem>>, vector<8x32xf32>
    %215 = vector.broadcast %25 : vector<1x32xf32> to vector<8x32xf32>
    %216 = arith.addf %196, %215 : vector<8x32xf32>
    %217 = arith.mulf %204, %216 : vector<8x32xf32>
    %218 = arith.addf %214, %217 : vector<8x32xf32>
    %219 = math.tanh %218 : vector<8x32xf32>
    %220 = arith.subf %189, %219 : vector<8x32xf32>
    %221 = arith.mulf %212, %220 : vector<8x32xf32>
    %222 = arith.addf %219, %221 : vector<8x32xf32>
    %223 = arith.index_cast %193 : i32 to index
    %c0_91 = arith.constant 0 : index
    %224 = vector.load %arg12[%223, %c0_91] : memref<64x32xf32, #tpu.memory_space<vmem>>, vector<8x32xf32>
    tpu.vector_store %arg12[%223, %c0_91], %222 {strides = array<i32>} : memref<64x32xf32, #tpu.memory_space<vmem>>, vector<8x32xf32>,
    %c6_i32 = arith.constant 6 : i32
    %c8_i32_92 = arith.constant 8 : i32
    %225 = arith.muli %c6_i32, %c8_i32_92 : i32
    %226 = tpu.assume_multiple %225, 8 : i32
    %cst_93 = arith.constant dense<0.000000e+00> : vector<8x32xf32>
    %227 = tpu.matmul %222, %22, %cst_93 {dimension_numbers = #tpu.dot_dimension_numbers<[1], [0], [0], [1], [0, 0, 1, 1], [], []>} : vector<8x32xf32>, vector<32x32xf32>, vector<8x32xf32> -> vector<8x32xf32>
    %cst_94 = arith.constant dense<0.000000e+00> : vector<8x32xf32>
    %228 = tpu.matmul %222, %23, %cst_94 {dimension_numbers = #tpu.dot_dimension_numbers<[1], [0], [0], [1], [0, 0, 1, 1], [], []>} : vector<8x32xf32>, vector<32x32xf32>, vector<8x32xf32> -> vector<8x32xf32>
    %cst_95 = arith.constant dense<0.000000e+00> : vector<8x32xf32>
    %229 = tpu.matmul %222, %24, %cst_95 {dimension_numbers = #tpu.dot_dimension_numbers<[1], [0], [0], [1], [0, 0, 1, 1], [], []>} : vector<8x32xf32>, vector<32x32xf32>, vector<8x32xf32> -> vector<8x32xf32>
    %230 = arith.index_cast %226 : i32 to index
    %c0_96 = arith.constant 0 : index
    %231 = vector.load %arg13[%230, %c0_96] : memref<64x32xf32, #tpu.memory_space<vmem>>, vector<8x32xf32>
    %232 = arith.addf %231, %227 : vector<8x32xf32>
    %233 = arith.negf %232 : vector<8x32xf32>
    %234 = math.exp %233 : vector<8x32xf32>
    %cst_97 = arith.constant 1.000000e+00 : f32
    %235 = vector.broadcast %cst_97 : f32 to vector<8x32xf32>
    %236 = arith.addf %235, %234 : vector<8x32xf32>
    %237 = arith.divf %235, %236 : vector<8x32xf32>
    %238 = arith.index_cast %226 : i32 to index
    %c0_98 = arith.constant 0 : index
    %239 = vector.load %arg14[%238, %c0_98] : memref<64x32xf32, #tpu.memory_space<vmem>>, vector<8x32xf32>
    %240 = arith.addf %239, %228 : vector<8x32xf32>
    %241 = arith.negf %240 : vector<8x32xf32>
    %242 = math.exp %241 : vector<8x32xf32>
    %cst_99 = arith.constant 1.000000e+00 : f32
    %243 = vector.broadcast %cst_99 : f32 to vector<8x32xf32>
    %244 = arith.addf %243, %242 : vector<8x32xf32>
    %245 = arith.divf %243, %244 : vector<8x32xf32>
    %246 = arith.index_cast %226 : i32 to index
    %c0_100 = arith.constant 0 : index
    %247 = vector.load %arg15[%246, %c0_100] : memref<64x32xf32, #tpu.memory_space<vmem>>, vector<8x32xf32>
    %248 = vector.broadcast %25 : vector<1x32xf32> to vector<8x32xf32>
    %249 = arith.addf %229, %248 : vector<8x32xf32>
    %250 = arith.mulf %237, %249 : vector<8x32xf32>
    %251 = arith.addf %247, %250 : vector<8x32xf32>
    %252 = math.tanh %251 : vector<8x32xf32>
    %253 = arith.subf %222, %252 : vector<8x32xf32>
    %254 = arith.mulf %245, %253 : vector<8x32xf32>
    %255 = arith.addf %252, %254 : vector<8x32xf32>
    %256 = arith.index_cast %226 : i32 to index
    %c0_101 = arith.constant 0 : index
    %257 = vector.load %arg12[%256, %c0_101] : memref<64x32xf32, #tpu.memory_space<vmem>>, vector<8x32xf32>
    tpu.vector_store %arg12[%256, %c0_101], %255 {strides = array<i32>} : memref<64x32xf32, #tpu.memory_space<vmem>>, vector<8x32xf32>,
    %c7_i32 = arith.constant 7 : i32
    %c8_i32_102 = arith.constant 8 : i32
    %258 = arith.muli %c7_i32, %c8_i32_102 : i32
    %259 = tpu.assume_multiple %258, 8 : i32
    %cst_103 = arith.constant dense<0.000000e+00> : vector<8x32xf32>
    %260 = tpu.matmul %255, %22, %cst_103 {dimension_numbers = #tpu.dot_dimension_numbers<[1], [0], [0], [1], [0, 0, 1, 1], [], []>} : vector<8x32xf32>, vector<32x32xf32>, vector<8x32xf32> -> vector<8x32xf32>
    %cst_104 = arith.constant dense<0.000000e+00> : vector<8x32xf32>
    %261 = tpu.matmul %255, %23, %cst_104 {dimension_numbers = #tpu.dot_dimension_numbers<[1], [0], [0], [1], [0, 0, 1, 1], [], []>} : vector<8x32xf32>, vector<32x32xf32>, vector<8x32xf32> -> vector<8x32xf32>
    %cst_105 = arith.constant dense<0.000000e+00> : vector<8x32xf32>
    %262 = tpu.matmul %255, %24, %cst_105 {dimension_numbers = #tpu.dot_dimension_numbers<[1], [0], [0], [1], [0, 0, 1, 1], [], []>} : vector<8x32xf32>, vector<32x32xf32>, vector<8x32xf32> -> vector<8x32xf32>
    %263 = arith.index_cast %259 : i32 to index
    %c0_106 = arith.constant 0 : index
    %264 = vector.load %arg13[%263, %c0_106] : memref<64x32xf32, #tpu.memory_space<vmem>>, vector<8x32xf32>
    %265 = arith.addf %264, %260 : vector<8x32xf32>
    %266 = arith.negf %265 : vector<8x32xf32>
    %267 = math.exp %266 : vector<8x32xf32>
    %cst_107 = arith.constant 1.000000e+00 : f32
    %268 = vector.broadcast %cst_107 : f32 to vector<8x32xf32>
    %269 = arith.addf %268, %267 : vector<8x32xf32>
    %270 = arith.divf %268, %269 : vector<8x32xf32>
    %271 = arith.index_cast %259 : i32 to index
    %c0_108 = arith.constant 0 : index
    %272 = vector.load %arg14[%271, %c0_108] : memref<64x32xf32, #tpu.memory_space<vmem>>, vector<8x32xf32>
    %273 = arith.addf %272, %261 : vector<8x32xf32>
    %274 = arith.negf %273 : vector<8x32xf32>
    %275 = math.exp %274 : vector<8x32xf32>
    %cst_109 = arith.constant 1.000000e+00 : f32
    %276 = vector.broadcast %cst_109 : f32 to vector<8x32xf32>
    %277 = arith.addf %276, %275 : vector<8x32xf32>
    %278 = arith.divf %276, %277 : vector<8x32xf32>
    %279 = arith.index_cast %259 : i32 to index
    %c0_110 = arith.constant 0 : index
    %280 = vector.load %arg15[%279, %c0_110] : memref<64x32xf32, #tpu.memory_space<vmem>>, vector<8x32xf32>
    %281 = vector.broadcast %25 : vector<1x32xf32> to vector<8x32xf32>
    %282 = arith.addf %262, %281 : vector<8x32xf32>
    %283 = arith.mulf %270, %282 : vector<8x32xf32>
    %284 = arith.addf %280, %283 : vector<8x32xf32>
    %285 = math.tanh %284 : vector<8x32xf32>
    %286 = arith.subf %255, %285 : vector<8x32xf32>
    %287 = arith.mulf %278, %286 : vector<8x32xf32>
    %288 = arith.addf %285, %287 : vector<8x32xf32>
    %289 = arith.index_cast %259 : i32 to index
    %c0_111 = arith.constant 0 : index
    %290 = vector.load %arg12[%289, %c0_111] : memref<64x32xf32, #tpu.memory_space<vmem>>, vector<8x32xf32>
    tpu.vector_store %arg12[%289, %c0_111], %288 {strides = array<i32>} : memref<64x32xf32, #tpu.memory_space<vmem>>, vector<8x32xf32>,
    %c8_i32_112 = arith.constant 8 : i32
    %c0_113 = arith.constant 0 : index
    %c0_114 = arith.constant 0 : index
    %291 = vector.load %arg16[%c0_113, %c0_114] : memref<8x32xf32, #tpu.memory_space<vmem>>, vector<8x32xf32>
    tpu.vector_store %arg16[%c0_113, %c0_114], %288 {strides = array<i32>} : memref<8x32xf32, #tpu.memory_space<vmem>>, vector<8x32xf32>,
    return
  }
  func.func @transform_0(%arg0: i32) -> (i32, i32) {
    %c0_i32 = arith.constant 0 : i32
    %c0_i32_0 = arith.constant 0 : i32
    return %arg0, %c0_i32 : i32, i32
  }
  func.func @transform_1(%arg0: i32) -> (i32, i32) {
    %c0_i32 = arith.constant 0 : i32
    %c0_i32_0 = arith.constant 0 : i32
    %c0_i32_1 = arith.constant 0 : i32
    return %c0_i32, %c0_i32_0 : i32, i32
  }
  func.func @transform_2(%arg0: i32) -> (i32, i32) {
    %c0_i32 = arith.constant 0 : i32
    %c0_i32_0 = arith.constant 0 : i32
    %c0_i32_1 = arith.constant 0 : i32
    return %c0_i32, %c0_i32_0 : i32, i32
  }
  func.func @transform_3(%arg0: i32) -> (i32, i32) {
    %c0_i32 = arith.constant 0 : i32
    %c0_i32_0 = arith.constant 0 : i32
    %c0_i32_1 = arith.constant 0 : i32
    return %c0_i32, %c0_i32_0 : i32, i32
  }
  func.func @transform_4(%arg0: i32) -> (i32, i32) {
    %c0_i32 = arith.constant 0 : i32
    %c0_i32_0 = arith.constant 0 : i32
    %c0_i32_1 = arith.constant 0 : i32
    return %c0_i32, %c0_i32_0 : i32, i32
  }
  func.func @transform_5(%arg0: i32) -> (i32, i32) {
    %c0_i32 = arith.constant 0 : i32
    %c0_i32_0 = arith.constant 0 : i32
    %c0_i32_1 = arith.constant 0 : i32
    return %c0_i32, %c0_i32_0 : i32, i32
  }
  func.func @transform_6(%arg0: i32) -> (i32, i32) {
    %c0_i32 = arith.constant 0 : i32
    %c0_i32_0 = arith.constant 0 : i32
    %c0_i32_1 = arith.constant 0 : i32
    return %c0_i32, %c0_i32_0 : i32, i32
  }
  func.func @transform_7(%arg0: i32) -> (i32, i32) {
    %c0_i32 = arith.constant 0 : i32
    %c0_i32_0 = arith.constant 0 : i32
    %c0_i32_1 = arith.constant 0 : i32
    return %c0_i32, %c0_i32_0 : i32, i32
  }
  func.func @transform_8(%arg0: i32) -> (i32, i32) {
    %c0_i32 = arith.constant 0 : i32
    %c0_i32_0 = arith.constant 0 : i32
    %c0_i32_1 = arith.constant 0 : i32
    return %c0_i32, %c0_i32_0 : i32, i32
  }
  func.func @transform_9(%arg0: i32) -> (i32, i32) {
    %c0_i32 = arith.constant 0 : i32
    %c0_i32_0 = arith.constant 0 : i32
    %c0_i32_1 = arith.constant 0 : i32
    return %c0_i32, %c0_i32_0 : i32, i32
  }
  func.func @transform_10(%arg0: i32) -> (i32, i32) {
    %c0_i32 = arith.constant 0 : i32
    %c0_i32_0 = arith.constant 0 : i32
    %c0_i32_1 = arith.constant 0 : i32
    return %c0_i32, %c0_i32_0 : i32, i32
  }
  func.func @transform_11(%arg0: i32) -> (i32, i32) {
    %c0_i32 = arith.constant 0 : i32
    %c0_i32_0 = arith.constant 0 : i32
    return %arg0, %c0_i32 : i32, i32
  }
}

</mosaic_0001>

<bundles_post_ra>
// kernel: tpu_custom_call.1
= control target key start
LH: loop header
LB: loop body
LE: loop exit
PB: predicated region body
PF: predicated region fallthrough
CT: control target
= control target key end

     0   :  { %16 = vsyncpa [#allocation7], 0  ;;  %s3639_s0 = inlined_call_operand.vmem [shape: f32[64,4], index: 0, kind: input, shape index: {}]   ;;  %s3640_s1 = inlined_call_operand.vmem [shape: f32[4,32], index: 1, kind: input, shape index: {}]   ;;  %s3641_s2 = inlined_call_operand.hbm [shape: f32[4,32], index: 2, kind: input, shape index: {}]   ;;  %s3642_s3 = inlined_call_operand.vmem [shape: f32[4,32], index: 3, kind: input, shape index: {}]   ;;  %s3643_s4 = inlined_call_operand.vmem [shape: f32[32,32], index: 4, kind: input, shape index: {}]   ;;  %s3644_s5 = inlined_call_operand.vmem [shape: f32[32,32], index: 5, kind: input, shape index: {}]   ;;  %s3645_s6 = inlined_call_operand.hbm [shape: f32[32,32], index: 6, kind: input, shape index: {}]   ;;  %s3646_s7 = inlined_call_operand.vmem [shape: f32[1,32], index: 7, kind: input, shape index: {}]   ;;  %s3647_s8 = inlined_call_operand.vmem [shape: f32[1,32], index: 8, kind: input, shape index: {}]   ;;  %s3648_s9 = inlined_call_operand.vmem [shape: f32[1,32], index: 9, kind: input, shape index: {}]   ;;  %s3649_s10 = inlined_call_operand.vmem [shape: f32[1,32], index: 10, kind: input, shape index: {}]   ;;  %s3650_s11 = inlined_call_operand.vmem [shape: f32[64,32], index: 11, kind: output, shape index: {}]  }
   0x1   :  { %17 = vsyncpa [#allocation9], 0  ;;  %s3097_s17 = smov [#allocation6]   ;;  %s3098_s19 = smov [#allocation8]  }
   0x2   :  { %s28_s18 = sshll.u32 %s3097_s17, 4  ;;  %s43_s20 = sshll.u32 %s3098_s19, 4  ;;  %s29_s18 = int_to_ptr.vmem [resolvable:$true] %s28_s18  ;;  %s44_s20 = int_to_ptr.vmem [resolvable:$true] %s43_s20 }
   0x3   :  { %s3061_s21 = scalar_lea.vmem %s29_s18, 64  ;;  %p3066_p1 = scmp.lt.s32.totalorder %s29_s18, %s29_s18 }
   0x4   :  { %p3062_p0 = scmp.ne.s32.totalorder %s29_s18, %s3061_s21  ;;  %p3067_p2 = scmp.lt.s32.totalorder %s3061_s21, %s3061_s21 }
   0x6   :  { %p3068_p3 = por %p3067_p2, %p3066_p1 }
   0x8   :  { %p3069_p4 = pnand %p3068_p3, %p3062_p0 }
   0xa   :  { %3072 = shalt.err (!%p3069_p4)
}
   0xb   :  { %31 = dma.hbm_to_vmem [thread:$0]  %s3641_s2, 64, %s29_s18, [#allocation7]  }
   0xc   :  { %s3081_s24 = scalar_lea.vmem %s44_s20, 512  ;;  %p3086_p6 = scmp.lt.s32.totalorder %s44_s20, %s44_s20 }
   0xd   :  { %p3082_p5 = scmp.ne.s32.totalorder %s44_s20, %s3081_s24  ;;  %p3087_p7 = scmp.lt.s32.totalorder %s3081_s24, %s3081_s24 }
   0xf   :  { %p3088_p8 = por %p3087_p7, %p3086_p6 }
  0x11   :  { %p3089_p9 = pnand %p3088_p8, %p3082_p5 }
  0x13   :  { %3092 = shalt.err (!%p3089_p9)
}
  0x14   :  { %s3099_s25 = smov 128   ;;  %s3100_s26 = smov 8  }
  0x15   :  { %49 = dma.hbm_to_vmem [thread:$0]  %s3645_s6, 512, %s44_s20, [#allocation9], %s3099_s25, %s3099_s25, %s3100_s26  }
  0x16   :  { %3093 = dma.done.wait [#allocation7], 64  }
  0x17   :  { %3094 = vsyncadd [#allocation7], 4294967232 }
  0x18   :  { %3095 = dma.done.wait [#allocation9], 512  }
  0x19   :  { %3096 = vsyncadd [#allocation9], 4294966784  ;;  %vm68_vm0 = vcmask 261120   ;;  %v3101_v0 = vmov 0.0   ;;  %vm111_vm1 = vcmask 1043456   ;;  %vm86_vm2 = vcmask 31744  }
  0x1a   :  { %69 = vst.msk [vmem:[#allocation5] sm:$0xff] %vm68_vm0, %v3101_v0  ;;  %v229_v1 = vld [vmem:[#allocation6] sm:$0xf]  ;;  %v70_v2 = vld [vmem:[%s3639_s0] sm:$0xff]  ;;  %v3185_v5 = vld [vmem:[%s3643_s4 + $0x18] sm:$0xff]  ;;  %vm3102_vm3 = vmmov 0  }
  0x1b   :  { %v71_v3 = vld [vmem:[%s3639_s0 + $0x8] sm:$0xff]  ;;  %2667 = vmatprep.subr.msk.mxu1 %vm111_vm1, %v229_v1  ;;  %2669 = vmatprep.mubr.msk.f32.mxu1 %vm86_vm2, %v70_v2  ;;  %v78_v4 = vld [vmem:[%s3640_s1] sm:$0xf]  ;;  %v72_v6 = vld [vmem:[%s3639_s0 + $0x10] sm:$0xff] }
  0x1c   :  { %2668 = vmatpush3.msk.msra.mxu1 %vm111_vm1, %v229_v1  ;;  %2653 = vmatprep.subr.msk.mxu0 %vm111_vm1, %v78_v4  ;;  %v73_v7 = vld [vmem:[%s3639_s0 + $0x18] sm:$0xff]  ;;  %v353_v8 = vld [vmem:[%s3642_s3] sm:$0xf]  ;;  %v3207_v9 = vld [vmem:[%s3643_s4 + $0x10] sm:$0xff] }
  0x1d   :  { %2670 = vmatmul.mubr.msk.f32.vlgmr.msra.gmra.mxu1 %vm86_vm2, %v71_v3  ;;  %2695 = vmatprep.subr.mxu1 %v3101_v0  ;;  %v74_v10 = vld [vmem:[%s3639_s0 + $0x20] sm:$0xff]  ;;  %v3218_v11 = vld [vmem:[%s3643_s4 + $0x8] sm:$0xff]  ;;  %v76_v13 = vld [vmem:[%s3639_s0 + $0x30] sm:$0xff] }
  0x1e   :  { %2696 = vmatpush3.msra.mxu1 %v3185_v5  ;;  %2654 = vmatpush3.msk.msra.mxu0 %vm111_vm1, %v78_v4  ;;  %v75_v12 = vld [vmem:[%s3639_s0 + $0x28] sm:$0xff]  ;;  %v3233_v14 = vld [vmem:[%s3643_s4] sm:$0xff]  ;;  %v77_v15 = vld [vmem:[%s3639_s0 + $0x38] sm:$0xff] }
  0x1f   :  { %2655 = vmatprep.mubr.msk.f32.mxu0 %vm86_vm2, %v70_v2  ;;  %2672 = vmatprep.mubr.msk.f32.mxu1 %vm86_vm2, %v72_v6  ;;  %v3257_v17 = vld [vmem:[%s3644_s5 + $0x18] sm:$0xff]  ;;  %v3266_v18 = vld [vmem:[%s3644_s5 + $0x10] sm:$0xff]  ;;  %v3275_v19 = vld [vmem:[%s3644_s5 + $0x8] sm:$0xff] }
  0x20   :  { %2656 = vmatmul.mubr.msk.f32.vlgmr.msra.gmra.mxu0 %vm86_vm2, %v71_v3  ;;  %2697 = vmatprep.subr.mxu1 %v3101_v0  ;;  %v3284_v20 = vld [vmem:[%s3644_s5] sm:$0xff]  ;;  %v3301_v23 = vld [vmem:[#allocation8 + $0x8] sm:$0xff]  ;;  %v3307_v24 = vld [vmem:[#allocation8] sm:$0xff] }
  0x21   :  { %2673 = vmatmul.mubr.msk.f32.gmra.mxu1 %vm86_vm2, %v73_v7  ;;  %2681 = vmatprep.subr.msk.mxu0 %vm111_vm1, %v353_v8  ;;  %v3252_v16 = vld [vmem:[#allocation5] sm:$0xff] }
  0x22   :  { %2698 = vmatpush3.msra.mxu1 %v3207_v9  ;;  %2675 = vmatprep.mubr.msk.f32.mxu1 %vm86_vm2, %v74_v10  ;;  %v3286_v21 = vld [vmem:[#allocation8 + $0x18] sm:$0xff]  ;;  %v3296_v22 = vld [vmem:[#allocation8 + $0x10] sm:$0xff] }
  0x23   :  { %2699 = vmatprep.subr.mxu1 %v3101_v0  ;;  %2682 = vmatpush3.msk.msra.mxu0 %vm111_vm1, %v353_v8  ;;  %v2438_v25 = vld [vmem:[%s3647_s8] ss:$0 sm:$0xff] }
  0x24   :  { %2700 = vmatpush3.msra.mxu1 %v3218_v11  ;;  %2658 = vmatprep.mubr.msk.f32.mxu0 %vm86_vm2, %v72_v6  ;;  %v2428_v28 = vld [vmem:[%s3646_s7] ss:$0 sm:$0xff] }
  0x25   :  { %2676 = vmatmul.mubr.msk.f32.gmra.mxu1 %vm86_vm2, %v75_v12  ;;  %2701 = vmatprep.subr.mxu1 %v3101_v0  ;;  %v2448_v63 = vld [vmem:[%s3648_s9] ss:$0 sm:$0xff] }
  0x26   :  { %2678 = vmatprep.mubr.msk.f32.mxu1 %vm86_vm2, %v76_v13  ;;  %2702 = vmatpush3.msra.mxu1 %v3233_v14 }
  0x27   :  { %2706 = vmatprep.subr.mxu1 %v3101_v0  ;;  %2659 = vmatmul.mubr.msk.f32.gmra.mxu0 %vm86_vm2, %v73_v7 }
  0x28   :  { %2661 = vmatprep.mubr.msk.f32.mxu0 %vm86_vm2, %v74_v10  ;;  %2717 = vmatprep.subr.mxu0 %v3101_v0 }
  0x29   :  { %2679 = vmatmul.mubr.msk.f32.gmra.mxu1 %vm86_vm2, %v77_v15 }
  0x2a   :  { %2703 = vmatprep.mubr.msk.f32.mxu1 %vm3102_vm3, %v3101_v0 }
  0x2b   :  { %2662 = vmatmul.mubr.msk.f32.gmra.mxu0 %vm86_vm2, %v75_v12 }
  0x2c   :  { %2664 = vmatprep.mubr.msk.f32.mxu0 %vm86_vm2, %v76_v13 }
  0x2d   :  { %2704 = vmatmul.mubr.msk.f32.vlgmr.msra.gmra.mxu1 %vm68_vm0, %v3252_v16 }
  0x2e   :  { %2707 = vmatpush3.msra.mxu1 %v3257_v17  ;;  %2714 = vmatprep.mubr.msk.f32.mxu1 %vm3102_vm3, %v3101_v0 }
  0x2f   :  { %2708 = vmatprep.subr.mxu1 %v3101_v0  ;;  %2665 = vmatmul.mubr.msk.f32.gmra.mxu0 %vm86_vm2, %v77_v15 }
  0x30   :  { %2709 = vmatpush3.msra.mxu1 %v3266_v18  ;;  %2683 = vmatprep.mubr.msk.f32.mxu0 %vm86_vm2, %v70_v2 }
  0x31   :  { %2710 = vmatprep.subr.mxu1 %v3101_v0 }
  0x32   :  { %2711 = vmatpush3.msra.mxu1 %v3275_v19 }
  0x33   :  { %2712 = vmatprep.subr.mxu1 %v3101_v0  ;;  %2684 = vmatmul.mubr.msk.f32.vlgmr.msra.gmra.mxu0 %vm86_vm2, %v71_v3 }
  0x34   :  { %2713 = vmatpush3.msra.mxu1 %v3284_v20  ;;  %2718 = vmatpush3.msra.mxu0 %v3286_v21 }
  0x35   :  { %2715 = vmatmul.mubr.msk.f32.vlgmr.msra.gmra.mxu1 %vm68_vm0, %v3252_v16  ;;  %2686 = vmatprep.mubr.msk.f32.mxu0 %vm86_vm2, %v72_v6 }
  0x36   :  { %2719 = vmatprep.subr.mxu0 %v3101_v0  ;;  %2728 = vmatprep.subr.mxu1 %v3101_v0 }
  0x37   :  { %2687 = vmatmul.mubr.msk.f32.gmra.mxu0 %vm86_vm2, %v73_v7  ;;  %2729 = vmatpush3.msra.mxu1 %v3185_v5 }
  0x38   :  { %2720 = vmatpush3.msra.mxu0 %v3296_v22  ;;  %2689 = vmatprep.mubr.msk.f32.mxu0 %vm86_vm2, %v74_v10 }
  0x39   :  { %2721 = vmatprep.subr.mxu0 %v3101_v0  ;;  %2730 = vmatprep.subr.mxu1 %v3101_v0 }
  0x3a   :  { %2722 = vmatpush3.msra.mxu0 %v3301_v23  ;;  %2731 = vmatpush3.msra.mxu1 %v3207_v9 }
  0x3b   :  { %2690 = vmatmul.mubr.msk.f32.gmra.mxu0 %vm86_vm2, %v75_v12  ;;  %2723 = vmatprep.subr.mxu0 %v3101_v0 }
  0x3c   :  { %2692 = vmatprep.mubr.msk.f32.mxu0 %vm86_vm2, %v76_v13  ;;  %2724 = vmatpush3.msra.mxu0 %v3307_v24 }
  0x3d   :  { %2739 = vmatprep.subr.mxu0 %v3101_v0  ;;  %2732 = vmatprep.subr.mxu1 %v3101_v0 }
  0x3e   :  { %2733 = vmatpush3.msra.mxu1 %v3218_v11  ;;  %2736 = vmatprep.mubr.msk.f32.mxu1 %vm3102_vm3, %v3101_v0 }
  0x3f   :  { %2693 = vmatmul.mubr.msk.f32.gmra.mxu0 %vm86_vm2, %v77_v15  ;;  %2734 = vmatprep.subr.mxu1 %v3101_v0 }
  0x40   :  { %2725 = vmatprep.mubr.msk.f32.mxu0 %vm3102_vm3, %v3101_v0  ;;  %2735 = vmatpush3.msra.mxu1 %v3233_v14 }
  0x41   :  { %2750 = vmatprep.subr.mxu1 %v3101_v0 }
  0x43   :  { %2726 = vmatmul.mubr.msk.f32.vlgmr.msra.gmra.mxu0 %vm68_vm0, %v3252_v16 }
  0x44   :  { %2740 = vmatpush3.msra.mxu0 %v3257_v17  ;;  %2747 = vmatprep.mubr.msk.f32.mxu0 %vm3102_vm3, %v3101_v0 }
  0x45   :  { %2741 = vmatprep.subr.mxu0 %v3101_v0 }
  0x46   :  { %2742 = vmatpush3.msra.mxu0 %v3266_v18 }
  0x47   :  { %2743 = vmatprep.subr.mxu0 %v3101_v0 }
  0x48   :  { %2744 = vmatpush3.msra.mxu0 %v3275_v19 }
  0x49   :  { %2745 = vmatprep.subr.mxu0 %v3101_v0 }
  0x4a   :  { %2746 = vmatpush3.msra.mxu0 %v3284_v20 }
  0x4b   :  { %2761 = vmatprep.subr.mxu0 %v3101_v0 }
  0xdd   :  { %v2671_v26 = vpop.f32.mrf.mxu1 }
  0xde   :  { %v312_v27 = vadd.f32 %v2671_v26, %v2438_v25 }
  0xdf   :  { %v306_v29 = vpop.f32.mrf.mxu1 }
  0xe0   :  { %346 = vst.msk [vmem:[#allocation3 + $0x8] sm:$0xff] %vm68_vm0, %v312_v27  ;;  %v307_v30 = vadd.f32 %v2438_v25, %v306_v29  ;;  %v2657_v31 = vpop.f32.mrf.mxu0 }
  0xe1   :  { %v187_v32 = vadd.f32 %v2657_v31, %v2428_v28  ;;  %v2674_v33 = vpop.f32.mrf.mxu1 }
  0xe2   :  { %345 = vst.msk [vmem:[#allocation3] sm:$0xff] %vm68_vm0, %v307_v30  ;;  %v322_v34 = vadd.f32 %v2674_v33, %v2438_v25  ;;  %v181_v35 = vpop.f32.mrf.mxu0 }
  0xe3   :  { %222 = vst.msk [vmem:[#allocation2 + $0x8] sm:$0xff] %vm68_vm0, %v187_v32  ;;  %v182_v36 = vadd.f32 %v2428_v28, %v181_v35  ;;  %v316_v37 = vpop.f32.mrf.mxu1 }
  0xe4   :  { %348 = vst.msk [vmem:[#allocation3 + $0x18] sm:$0xff] %vm68_vm0, %v322_v34  ;;  %v317_v38 = vadd.f32 %v2438_v25, %v316_v37 }
  0xe5   :  { %221 = vst.msk [vmem:[#allocation2] sm:$0xff] %vm68_vm0, %v182_v36  ;;  %v2677_v39 = vpop.f32.mrf.mxu1 }
  0xe6   :  { %347 = vst.msk [vmem:[#allocation3 + $0x10] sm:$0xff] %vm68_vm0, %v317_v38  ;;  %v332_v40 = vadd.f32 %v2677_v39, %v2438_v25 }
  0xe7   :  { %v326_v41 = vpop.f32.mrf.mxu1  ;;  %v2660_v42 = vpop.f32.mrf.mxu0 }
  0xe8   :  { %350 = vst.msk [vmem:[#allocation3 + $0x28] sm:$0xff] %vm68_vm0, %v332_v40  ;;  %v327_v43 = vadd.f32 %v2438_v25, %v326_v41  ;;  %v197_v44 = vadd.f32 %v2660_v42, %v2428_v28  ;;  %v3375_v40 = vld [vmem:[%s3649_s10] ss:$0 sm:$0xff] }
  0xe9   :  { %v2680_v45 = vpop.f32.mrf.mxu1  ;;  %v191_v46 = vpop.f32.mrf.mxu0  ;;  %v642_v12 = vld [vmem:[#allocation3] sm:$0xff] }
  0xea   :  { %349 = vst.msk [vmem:[#allocation3 + $0x20] sm:$0xff] %vm68_vm0, %v327_v43  ;;  %v342_v47 = vadd.f32 %v2680_v45, %v2438_v25  ;;  %224 = vst.msk [vmem:[#allocation2 + $0x18] sm:$0xff] %vm68_vm0, %v197_v44  ;;  %v192_v48 = vadd.f32 %v2428_v28, %v191_v46 }
  0xeb   :  { %v336_v49 = vpop.f32.mrf.mxu1  ;;  %v2663_v50 = vpop.f32.mrf.mxu0 }
  0xec   :  { %352 = vst.msk [vmem:[#allocation3 + $0x38] sm:$0xff] %vm68_vm0, %v342_v47  ;;  %v337_v51 = vadd.f32 %v2438_v25, %v336_v49  ;;  %223 = vst.msk [vmem:[#allocation2 + $0x10] sm:$0xff] %vm68_vm0, %v192_v48  ;;  %v207_v52 = vadd.f32 %v2663_v50, %v2428_v28  ;;  %v634_v54 = vld [vmem:[#allocation2] sm:$0xff] }
  0xed   :  { %v560_v53 = vpop.f32.mrf.mxu1  ;;  %v201_v55 = vpop.f32.mrf.mxu0 }
  0xee   :  { %351 = vst.msk [vmem:[#allocation3 + $0x30] sm:$0xff] %vm68_vm0, %v337_v51  ;;  %v635_v56 = vadd.f32 %v634_v54, %v560_v53  ;;  %226 = vst.msk [vmem:[#allocation2 + $0x28] sm:$0xff] %vm68_vm0, %v207_v52  ;;  %v202_v57 = vadd.f32 %v2428_v28, %v201_v55  ;;  %v878_v53 = vld [vmem:[#allocation2 + $0x8] sm:$0xff] }
  0xef   :  { %v2705_v58 = vpop.f32.mrf.mxu1  ;;  %v2666_v59 = vpop.f32.mrf.mxu0 }
  0xf0   :  { %v2460_v60 = vmul.f32 -1.442695, %v635_v56  ;;  %225 = vst.msk [vmem:[#allocation2 + $0x20] sm:$0xff] %vm68_vm0, %v202_v57  ;;  %v217_v61 = vadd.f32 %v2666_v59, %v2428_v28 }
  0xf1   :  { %v211_v62 = vpop.f32.mrf.mxu0 }
  0xf2   :  { %2965 = vpow2.f32 %v2460_v60  ;;  %228 = vst.msk [vmem:[#allocation2 + $0x38] sm:$0xff] %vm68_vm0, %v217_v61  ;;  %v212_v1 = vadd.f32 %v2428_v28, %v211_v62  ;;  %v887_v61 = vld [vmem:[#allocation3 + $0x8] sm:$0xff] }
  0xf3   :  { %v2685_v2 = vpop.f32.mrf.mxu0 }
  0xf4   :  { %227 = vst.msk [vmem:[#allocation2 + $0x30] sm:$0xff] %vm68_vm0, %v212_v1  ;;  %v436_v3 = vadd.f32 %v2685_v2, %v2448_v63 }
  0xf5   :  { %v630_v4 = vpop.f32.mrf.mxu1  ;;  %v430_v6 = vpop.f32.mrf.mxu0 }
  0xf6   :  { %470 = vst.msk [vmem:[#allocation4 + $0x8] sm:$0xff] %vm68_vm0, %v436_v3  ;;  %v431_v7 = vadd.f32 %v2448_v63, %v430_v6  ;;  %v643_v15 = vadd.f32 %v642_v12, %v630_v4 }
  0xf7   :  { %v2688_v8 = vpop.f32.mrf.mxu0  ;;  %v2716_v10 = vpop.f32.mrf.mxu1 }
  0xf8   :  { %469 = vst.msk [vmem:[#allocation4] sm:$0xff] %vm68_vm0, %v431_v7  ;;  %v446_v13 = vadd.f32 %v2688_v8, %v2448_v63  ;;  %v2461_v29 = vmul.f32 -1.442695, %v643_v15 }
  0xf9   :  { %v440_v25 = vpop.f32.mrf.mxu0 }
  0xfa   :  { %472 = vst.msk [vmem:[#allocation4 + $0x18] sm:$0xff] %vm68_vm0, %v446_v13  ;;  %v441_v26 = vadd.f32 %v2448_v63, %v440_v25  ;;  %2967 = vpow2.f32 %v2461_v29  ;;  %v1119_v29 = vld [vmem:[#allocation2 + $0x10] sm:$0xff] }
  0xfb   :  { %v2691_v27 = vpop.f32.mrf.mxu0 }
  0xfc   :  { %471 = vst.msk [vmem:[#allocation4 + $0x10] sm:$0xff] %vm68_vm0, %v441_v26  ;;  %v456_v28 = vadd.f32 %v2691_v27, %v2448_v63 }
  0xfd   :  { %v450_v30 = vpop.f32.mrf.mxu0  ;;  %v896_v8 = vld [vmem:[#allocation4 + $0x8] sm:$0xff] }
  0xfe   :  { %474 = vst.msk [vmem:[#allocation4 + $0x28] sm:$0xff] %vm68_vm0, %v456_v28  ;;  %v451_v31 = vadd.f32 %v2448_v63, %v450_v30 }
  0xff   :  { %v2966_v32 = vpop.eup %2965  ;;  %v2694_v33 = vpop.f32.mrf.mxu0  ;;  %v650_v45 = vld [vmem:[#allocation4] sm:$0xff] }
 0x100   :  { %v639_v34 = vadd.f32 1.0, %v2966_v32  ;;  %473 = vst.msk [vmem:[#allocation4 + $0x20] sm:$0xff] %vm68_vm0, %v451_v31  ;;  %v466_v35 = vadd.f32 %v2694_v33, %v2448_v63 }
 0x101   :  { %v460_v36 = vpop.f32.mrf.mxu0 }
 0x102   :  { %2969 = vrcp.f32 %v639_v34  ;;  %476 = vst.msk [vmem:[#allocation4 + $0x38] sm:$0xff] %vm68_vm0, %v466_v35  ;;  %v461_v37 = vadd.f32 %v2448_v63, %v460_v36 }
 0x103   :  { %v723_v38 = vpop.f32.mrf.mxu0 }
 0x104   :  { %475 = vst.msk [vmem:[#allocation4 + $0x30] sm:$0xff] %vm68_vm0, %v461_v37  ;;  %v724_v41 = vadd.f32 %v3375_v40, %v723_v38  ;;  %v1128_v37 = vld [vmem:[#allocation3 + $0x10] sm:$0xff] }
 0x105   :  { %v2727_v39 = vpop.f32.mrf.mxu0 }
 0x107   :  { %v2968_v42 = vpop.eup %2967 }
 0x108   :  { %v647_v46 = vadd.f32 1.0, %v2968_v42 }
 0x10f   :  { %v2970_v43 = vpop.eup %2969 }
 0x110   :  { %v727_v44 = vmul.f32 %v2970_v43, %v724_v41 }
 0x112   :  { %v728_v47 = vadd.f32 %v727_v44, %v650_v45 }
 0x114   :  { %2971 = vtanh.f32 %v728_v47  ;;  %v1137_v47 = vld [vmem:[#allocation4 + $0x10] sm:$0xff] }
 0x115   :  { %2973 = vrcp.f32 %v647_v46 }
 0x121   :  { %v2972_v48 = vpop.eup %2971 }
 0x122   :  { %v730_v49 = vsub.f32 %v3252_v16, %v2972_v48  ;;  %v2974_v50 = vpop.eup %2973 }
 0x124   :  { %v731_v51 = vmul.f32 %v2974_v50, %v730_v49 }
 0x126   :  { %v732_v52 = vadd.f32 %v2972_v48, %v731_v51 }
 0x128   :  { %733 = vst.msk [vmem:[%s3650_s11] sm:$0xff] %vm68_vm0, %v732_v52  ;;  %2737 = vmatmul.mubr.msk.f32.vlgmr.msra.gmra.mxu1 %vm68_vm0, %v732_v52  ;;  %2748 = vmatmul.mubr.msk.f32.vlgmr.msra.gmra.mxu0 %vm68_vm0, %v732_v52 }
 0x129   :  { %2751 = vmatpush3.msra.mxu1 %v3286_v21  ;;  %2758 = vmatprep.mubr.msk.f32.mxu1 %vm3102_vm3, %v3101_v0 }
 0x12a   :  { %2752 = vmatprep.subr.mxu1 %v3101_v0  ;;  %2762 = vmatpush3.msra.mxu0 %v3185_v5 }
 0x12b   :  { %2753 = vmatpush3.msra.mxu1 %v3296_v22  ;;  %2763 = vmatprep.subr.mxu0 %v3101_v0 }
 0x12c   :  { %2754 = vmatprep.subr.mxu1 %v3101_v0  ;;  %2764 = vmatpush3.msra.mxu0 %v3207_v9 }
 0x12d   :  { %2755 = vmatpush3.msra.mxu1 %v3301_v23  ;;  %2765 = vmatprep.subr.mxu0 %v3101_v0 }
 0x12e   :  { %2756 = vmatprep.subr.mxu1 %v3101_v0  ;;  %2766 = vmatpush3.msra.mxu0 %v3218_v11 }
 0x12f   :  { %2757 = vmatpush3.msra.mxu1 %v3307_v24  ;;  %2767 = vmatprep.subr.mxu0 %v3101_v0 }
 0x130   :  { %2759 = vmatmul.mubr.msk.f32.vlgmr.msra.gmra.mxu1 %vm68_vm0, %v732_v52  ;;  %2772 = vmatprep.subr.mxu1 %v3101_v0 }
 0x131   :  { %2773 = vmatpush3.msra.mxu1 %v3257_v17  ;;  %2768 = vmatpush3.msra.mxu0 %v3233_v14 }
 0x132   :  { %2774 = vmatprep.subr.mxu1 %v3101_v0  ;;  %2769 = vmatprep.mubr.msk.f32.mxu0 %vm3102_vm3, %v3101_v0 }
 0x133   :  { %2775 = vmatpush3.msra.mxu1 %v3266_v18  ;;  %2780 = vmatprep.mubr.msk.f32.mxu1 %vm3102_vm3, %v3101_v0 }
 0x134   :  { %2776 = vmatprep.subr.mxu1 %v3101_v0  ;;  %2783 = vmatprep.subr.mxu0 %v3101_v0 }
 0x135   :  { %2777 = vmatpush3.msra.mxu1 %v3275_v19 }
 0x136   :  { %2778 = vmatprep.subr.mxu1 %v3101_v0 }
 0x137   :  { %2779 = vmatpush3.msra.mxu1 %v3284_v20 }
 0x138   :  { %2794 = vmatprep.subr.mxu1 %v3101_v0 }
 0x1e8   :  { %v803_v16 = vpop.f32.mrf.mxu1  ;;  %v873_v54 = vpop.f32.mrf.mxu0 }
 0x1e9   :  { %v879_v55 = vadd.f32 %v878_v53, %v803_v16  ;;  %v888_v62 = vadd.f32 %v887_v61, %v873_v54 }
 0x1ea   :  { %v2738_v56 = vpop.f32.mrf.mxu1  ;;  %v2749_v57 = vpop.f32.mrf.mxu0 }
 0x1eb   :  { %v2466_v58 = vmul.f32 -1.442695, %v879_v55  ;;  %v2467_v63 = vmul.f32 -1.442695, %v888_v62  ;;  %v1360_v55 = vld [vmem:[#allocation2 + $0x18] sm:$0xff] }
 0x1ed   :  { %2975 = vpow2.f32 %v2466_v58 }
 0x1ee   :  { %2977 = vpow2.f32 %v2467_v63  ;;  %v1369_v63 = vld [vmem:[#allocation3 + $0x18] sm:$0xff] }
 0x1f0   :  { %v963_v59 = vpop.f32.mrf.mxu1 }
 0x1f1   :  { %v964_v4 = vadd.f32 %v3375_v40, %v963_v59 }
 0x1f2   :  { %v2760_v60 = vpop.f32.mrf.mxu1 }
 0x1fa   :  { %v2976_v1 = vpop.eup %2975 }
 0x1fb   :  { %v883_v2 = vadd.f32 1.0, %v2976_v1  ;;  %v2978_v3 = vpop.eup %2977 }
 0x1fc   :  { %v892_v10 = vadd.f32 1.0, %v2978_v3 }
 0x1fd   :  { %2979 = vrcp.f32 %v883_v2 }
 0x20a   :  { %v2980_v6 = vpop.eup %2979 }
 0x20b   :  { %v967_v7 = vmul.f32 %v2980_v6, %v964_v4 }
 0x20d   :  { %v968_v12 = vadd.f32 %v967_v7, %v896_v8 }
 0x20f   :  { %2981 = vtanh.f32 %v968_v12  ;;  %v1378_v12 = vld [vmem:[#allocation4 + $0x18] sm:$0xff] }
 0x210   :  { %2983 = vrcp.f32 %v892_v10 }
 0x21c   :  { %v2982_v13 = vpop.eup %2981 }
 0x21d   :  { %v970_v15 = vsub.f32 %v732_v52, %v2982_v13  ;;  %v2984_v25 = vpop.eup %2983 }
 0x21f   :  { %v971_v26 = vmul.f32 %v2984_v25, %v970_v15 }
 0x221   :  { %v972_v27 = vadd.f32 %v2982_v13, %v971_v26 }
 0x223   :  { %2469 = vst.msk [vmem:[%s3650_s11 + $0x8] sm:$0xff] %vm68_vm0, %v972_v27  ;;  %2770 = vmatmul.mubr.msk.f32.vlgmr.msra.gmra.mxu0 %vm68_vm0, %v972_v27  ;;  %2781 = vmatmul.mubr.msk.f32.vlgmr.msra.gmra.mxu1 %vm68_vm0, %v972_v27 }
 0x224   :  { %2784 = vmatpush3.msra.mxu0 %v3286_v21  ;;  %2791 = vmatprep.mubr.msk.f32.mxu0 %vm3102_vm3, %v3101_v0 }
 0x225   :  { %2785 = vmatprep.subr.mxu0 %v3101_v0  ;;  %2795 = vmatpush3.msra.mxu1 %v3185_v5 }
 0x226   :  { %2786 = vmatpush3.msra.mxu0 %v3296_v22  ;;  %2796 = vmatprep.subr.mxu1 %v3101_v0 }
 0x227   :  { %2787 = vmatprep.subr.mxu0 %v3101_v0  ;;  %2797 = vmatpush3.msra.mxu1 %v3207_v9 }
 0x228   :  { %2788 = vmatpush3.msra.mxu0 %v3301_v23  ;;  %2798 = vmatprep.subr.mxu1 %v3101_v0 }
 0x229   :  { %2789 = vmatprep.subr.mxu0 %v3101_v0  ;;  %2799 = vmatpush3.msra.mxu1 %v3218_v11 }
 0x22a   :  { %2790 = vmatpush3.msra.mxu0 %v3307_v24  ;;  %2800 = vmatprep.subr.mxu1 %v3101_v0 }
 0x22b   :  { %2792 = vmatmul.mubr.msk.f32.vlgmr.msra.gmra.mxu0 %vm68_vm0, %v972_v27  ;;  %2805 = vmatprep.subr.mxu0 %v3101_v0 }
 0x22c   :  { %2806 = vmatpush3.msra.mxu0 %v3257_v17  ;;  %2801 = vmatpush3.msra.mxu1 %v3233_v14 }
 0x22d   :  { %2807 = vmatprep.subr.mxu0 %v3101_v0  ;;  %2802 = vmatprep.mubr.msk.f32.mxu1 %vm3102_vm3, %v3101_v0 }
 0x22e   :  { %2808 = vmatpush3.msra.mxu0 %v3266_v18  ;;  %2813 = vmatprep.mubr.msk.f32.mxu0 %vm3102_vm3, %v3101_v0 }
 0x22f   :  { %2809 = vmatprep.subr.mxu0 %v3101_v0  ;;  %2816 = vmatprep.subr.mxu1 %v3101_v0 }
 0x230   :  { %2810 = vmatpush3.msra.mxu0 %v3275_v19 }
 0x231   :  { %2811 = vmatprep.subr.mxu0 %v3101_v0 }
 0x232   :  { %2812 = vmatpush3.msra.mxu0 %v3284_v20 }
 0x233   :  { %2827 = vmatprep.subr.mxu0 %v3101_v0 }
 0x2e3   :  { %v1044_v28 = vpop.f32.mrf.mxu0  ;;  %v1114_v30 = vpop.f32.mrf.mxu1 }
 0x2e4   :  { %v1120_v31 = vadd.f32 %v1119_v29, %v1044_v28  ;;  %v1129_v38 = vadd.f32 %v1128_v37, %v1114_v30 }
 0x2e5   :  { %v2771_v32 = vpop.f32.mrf.mxu0  ;;  %v2782_v33 = vpop.f32.mrf.mxu1 }
 0x2e6   :  { %v2472_v34 = vmul.f32 -1.442695, %v1120_v31  ;;  %v2473_v39 = vmul.f32 -1.442695, %v1129_v38  ;;  %v1601_v31 = vld [vmem:[#allocation2 + $0x20] sm:$0xff] }
 0x2e8   :  { %2985 = vpow2.f32 %v2472_v34 }
 0x2e9   :  { %2987 = vpow2.f32 %v2473_v39  ;;  %v1610_v39 = vld [vmem:[#allocation3 + $0x20] sm:$0xff] }
 0x2eb   :  { %v1204_v35 = vpop.f32.mrf.mxu0 }
 0x2ec   :  { %v1205_v44 = vadd.f32 %v3375_v40, %v1204_v35 }
 0x2ed   :  { %v2793_v36 = vpop.f32.mrf.mxu0 }
 0x2f5   :  { %v2986_v41 = vpop.eup %2985 }
 0x2f6   :  { %v1124_v42 = vadd.f32 1.0, %v2986_v41  ;;  %v2988_v43 = vpop.eup %2987 }
 0x2f7   :  { %v1133_v48 = vadd.f32 1.0, %v2988_v43 }
 0x2f8   :  { %2989 = vrcp.f32 %v1124_v42 }
 0x305   :  { %v2990_v45 = vpop.eup %2989 }
 0x306   :  { %v1208_v46 = vmul.f32 %v2990_v45, %v1205_v44 }
 0x308   :  { %v1209_v49 = vadd.f32 %v1208_v46, %v1137_v47 }
 0x30a   :  { %2991 = vtanh.f32 %v1209_v49  ;;  %v1619_v49 = vld [vmem:[#allocation4 + $0x20] sm:$0xff] }
 0x30b   :  { %2993 = vrcp.f32 %v1133_v48 }
 0x317   :  { %v2992_v50 = vpop.eup %2991 }
 0x318   :  { %v1211_v51 = vsub.f32 %v972_v27, %v2992_v50  ;;  %v2994_v52 = vpop.eup %2993 }
 0x31a   :  { %v1212_v16 = vmul.f32 %v2994_v52, %v1211_v51 }
 0x31c   :  { %v1213_v53 = vadd.f32 %v2992_v50, %v1212_v16 }
 0x31e   :  { %2475 = vst.msk [vmem:[%s3650_s11 + $0x10] sm:$0xff] %vm68_vm0, %v1213_v53  ;;  %2803 = vmatmul.mubr.msk.f32.vlgmr.msra.gmra.mxu1 %vm68_vm0, %v1213_v53  ;;  %2814 = vmatmul.mubr.msk.f32.vlgmr.msra.gmra.mxu0 %vm68_vm0, %v1213_v53 }
 0x31f   :  { %2817 = vmatpush3.msra.mxu1 %v3286_v21  ;;  %2824 = vmatprep.mubr.msk.f32.mxu1 %vm3102_vm3, %v3101_v0 }
 0x320   :  { %2818 = vmatprep.subr.mxu1 %v3101_v0  ;;  %2828 = vmatpush3.msra.mxu0 %v3185_v5 }
 0x321   :  { %2819 = vmatpush3.msra.mxu1 %v3296_v22  ;;  %2829 = vmatprep.subr.mxu0 %v3101_v0 }
 0x322   :  { %2820 = vmatprep.subr.mxu1 %v3101_v0  ;;  %2830 = vmatpush3.msra.mxu0 %v3207_v9 }
 0x323   :  { %2821 = vmatpush3.msra.mxu1 %v3301_v23  ;;  %2831 = vmatprep.subr.mxu0 %v3101_v0 }
 0x324   :  { %2822 = vmatprep.subr.mxu1 %v3101_v0  ;;  %2832 = vmatpush3.msra.mxu0 %v3218_v11 }
 0x325   :  { %2823 = vmatpush3.msra.mxu1 %v3307_v24  ;;  %2833 = vmatprep.subr.mxu0 %v3101_v0 }
 0x326   :  { %2825 = vmatmul.mubr.msk.f32.vlgmr.msra.gmra.mxu1 %vm68_vm0, %v1213_v53  ;;  %2838 = vmatprep.subr.mxu1 %v3101_v0 }
 0x327   :  { %2839 = vmatpush3.msra.mxu1 %v3257_v17  ;;  %2834 = vmatpush3.msra.mxu0 %v3233_v14 }
 0x328   :  { %2840 = vmatprep.subr.mxu1 %v3101_v0  ;;  %2835 = vmatprep.mubr.msk.f32.mxu0 %vm3102_vm3, %v3101_v0 }
 0x329   :  { %2841 = vmatpush3.msra.mxu1 %v3266_v18  ;;  %2846 = vmatprep.mubr.msk.f32.mxu1 %vm3102_vm3, %v3101_v0 }
 0x32a   :  { %2842 = vmatprep.subr.mxu1 %v3101_v0  ;;  %2849 = vmatprep.subr.mxu0 %v3101_v0 }
 0x32b   :  { %2843 = vmatpush3.msra.mxu1 %v3275_v19 }
 0x32c   :  { %2844 = vmatprep.subr.mxu1 %v3101_v0 }
 0x32d   :  { %2845 = vmatpush3.msra.mxu1 %v3284_v20 }
 0x32e   :  { %2860 = vmatprep.subr.mxu1 %v3101_v0 }
 0x3de   :  { %v1285_v54 = vpop.f32.mrf.mxu1  ;;  %v1355_v56 = vpop.f32.mrf.mxu0 }
 0x3df   :  { %v1361_v57 = vadd.f32 %v1360_v55, %v1285_v54  ;;  %v1370_v1 = vadd.f32 %v1369_v63, %v1355_v56 }
 0x3e0   :  { %v2804_v58 = vpop.f32.mrf.mxu1  ;;  %v2815_v59 = vpop.f32.mrf.mxu0 }
 0x3e1   :  { %v2478_v60 = vmul.f32 -1.442695, %v1361_v57  ;;  %v2479_v2 = vmul.f32 -1.442695, %v1370_v1 }
 0x3e3   :  { %2995 = vpow2.f32 %v2478_v60 }
 0x3e4   :  { %2997 = vpow2.f32 %v2479_v2 }
 0x3e6   :  { %v1445_v61 = vpop.f32.mrf.mxu1 }
 0x3e7   :  { %v1446_v7 = vadd.f32 %v3375_v40, %v1445_v61  ;;  %v1851_v61 = vld [vmem:[#allocation3 + $0x28] sm:$0xff] }
 0x3e8   :  { %v2826_v62 = vpop.f32.mrf.mxu1 }
 0x3f0   :  { %v2996_v3 = vpop.eup %2995 }
 0x3f1   :  { %v1365_v4 = vadd.f32 1.0, %v2996_v3  ;;  %v2998_v6 = vpop.eup %2997 }
 0x3f2   :  { %v1374_v13 = vadd.f32 1.0, %v2998_v6 }
 0x3f3   :  { %2999 = vrcp.f32 %v1365_v4 }
 0x400   :  { %v3000_v8 = vpop.eup %2999 }
 0x401   :  { %v1449_v10 = vmul.f32 %v3000_v8, %v1446_v7  ;;  %v1860_v8 = vld [vmem:[#allocation4 + $0x28] sm:$0xff] }
 0x403   :  { %v1450_v15 = vadd.f32 %v1449_v10, %v1378_v12 }
 0x405   :  { %3001 = vtanh.f32 %v1450_v15 }
 0x406   :  { %3003 = vrcp.f32 %v1374_v13 }
 0x412   :  { %v3002_v25 = vpop.eup %3001 }
 0x413   :  { %v1452_v26 = vsub.f32 %v1213_v53, %v3002_v25  ;;  %v3004_v27 = vpop.eup %3003 }
 0x415   :  { %v1453_v28 = vmul.f32 %v3004_v27, %v1452_v26 }
 0x417   :  { %v1454_v29 = vadd.f32 %v3002_v25, %v1453_v28  ;;  %v3045_v28 = vld [vmem:[%s3643_s4 + $0x18] sm:$0xff] }
 0x419   :  { %2481 = vst.msk [vmem:[%s3650_s11 + $0x18] sm:$0xff] %vm68_vm0, %v1454_v29  ;;  %2836 = vmatmul.mubr.msk.f32.vlgmr.msra.gmra.mxu0 %vm68_vm0, %v1454_v29  ;;  %2847 = vmatmul.mubr.msk.f32.vlgmr.msra.gmra.mxu1 %vm68_vm0, %v1454_v29 }
 0x41a   :  { %2850 = vmatpush3.msra.mxu0 %v3286_v21  ;;  %2857 = vmatprep.mubr.msk.f32.mxu0 %vm3102_vm3, %v3101_v0 }
 0x41b   :  { %2851 = vmatprep.subr.mxu0 %v3101_v0  ;;  %2861 = vmatpush3.msra.mxu1 %v3185_v5 }
 0x41c   :  { %2852 = vmatpush3.msra.mxu0 %v3296_v22  ;;  %2862 = vmatprep.subr.mxu1 %v3101_v0 }
 0x41d   :  { %2853 = vmatprep.subr.mxu0 %v3101_v0  ;;  %2863 = vmatpush3.msra.mxu1 %v3207_v9 }
 0x41e   :  { %2854 = vmatpush3.msra.mxu0 %v3301_v23  ;;  %2864 = vmatprep.subr.mxu1 %v3101_v0 }
 0x41f   :  { %2855 = vmatprep.subr.mxu0 %v3101_v0  ;;  %2865 = vmatpush3.msra.mxu1 %v3218_v11 }
 0x420   :  { %2856 = vmatpush3.msra.mxu0 %v3307_v24  ;;  %2866 = vmatprep.subr.mxu1 %v3101_v0 }
 0x421   :  { %2858 = vmatmul.mubr.msk.f32.vlgmr.msra.gmra.mxu0 %vm68_vm0, %v1454_v29  ;;  %2871 = vmatprep.subr.mxu0 %v3101_v0 }
 0x422   :  { %2872 = vmatpush3.msra.mxu0 %v3257_v17  ;;  %2867 = vmatpush3.msra.mxu1 %v3233_v14 }
 0x423   :  { %2873 = vmatprep.subr.mxu0 %v3101_v0  ;;  %2868 = vmatprep.mubr.msk.f32.mxu1 %vm3102_vm3, %v3101_v0 }
 0x424   :  { %2874 = vmatpush3.msra.mxu0 %v3266_v18  ;;  %2879 = vmatprep.mubr.msk.f32.mxu0 %vm3102_vm3, %v3101_v0 }
 0x425   :  { %2875 = vmatprep.subr.mxu0 %v3101_v0  ;;  %2882 = vmatprep.subr.mxu1 %v3101_v0 }
 0x426   :  { %2876 = vmatpush3.msra.mxu0 %v3275_v19 }
 0x427   :  { %2877 = vmatprep.subr.mxu0 %v3101_v0 }
 0x428   :  { %2878 = vmatpush3.msra.mxu0 %v3284_v20 }
 0x429   :  { %2893 = vmatprep.subr.mxu0 %v3101_v0 }
 0x4d9   :  { %v1526_v30 = vpop.f32.mrf.mxu0  ;;  %v1596_v32 = vpop.f32.mrf.mxu1 }
 0x4da   :  { %v1602_v33 = vadd.f32 %v1601_v31, %v1526_v30  ;;  %v1611_v41 = vadd.f32 %v1610_v39, %v1596_v32 }
 0x4db   :  { %v2837_v34 = vpop.f32.mrf.mxu0  ;;  %v2848_v35 = vpop.f32.mrf.mxu1 }
 0x4dc   :  { %v2484_v36 = vmul.f32 -1.442695, %v1602_v33  ;;  %v2485_v42 = vmul.f32 -1.442695, %v1611_v41  ;;  %v2092_v35 = vld [vmem:[#allocation3 + $0x30] sm:$0xff] }
 0x4de   :  { %3005 = vpow2.f32 %v2484_v36 }
 0x4df   :  { %3007 = vpow2.f32 %v2485_v42 }
 0x4e1   :  { %v1686_v37 = vpop.f32.mrf.mxu0 }
 0x4e2   :  { %v1687_v46 = vadd.f32 %v3375_v40, %v1686_v37 }
 0x4e3   :  { %v2859_v38 = vpop.f32.mrf.mxu0 }
 0x4eb   :  { %v3006_v43 = vpop.eup %3005 }
 0x4ec   :  { %v1606_v44 = vadd.f32 1.0, %v3006_v43  ;;  %v3008_v45 = vpop.eup %3007  ;;  %v2101_v43 = vld [vmem:[#allocation4 + $0x30] sm:$0xff] }
 0x4ed   :  { %v1615_v50 = vadd.f32 1.0, %v3008_v45 }
 0x4ee   :  { %3009 = vrcp.f32 %v1606_v44 }
 0x4fb   :  { %v3010_v47 = vpop.eup %3009 }
 0x4fc   :  { %v1690_v48 = vmul.f32 %v3010_v47, %v1687_v46 }
 0x4fe   :  { %v1691_v51 = vadd.f32 %v1690_v48, %v1619_v49 }
 0x500   :  { %3011 = vtanh.f32 %v1691_v51  ;;  %v3049_v51 = vld [vmem:[#allocation8 + $0x18] sm:$0xff] }
 0x501   :  { %3013 = vrcp.f32 %v1615_v50 }
 0x50d   :  { %v3012_v52 = vpop.eup %3011 }
 0x50e   :  { %v1693_v16 = vsub.f32 %v1454_v29, %v3012_v52  ;;  %v3014_v53 = vpop.eup %3013  ;;  %v3047_v29 = vld [vmem:[%s3643_s4 + $0x8] sm:$0xff] }
 0x510   :  { %v1694_v54 = vmul.f32 %v3014_v53, %v1693_v16  ;;  %v3051_v16 = vld [vmem:[#allocation8 + $0x8] sm:$0xff]  ;;  %v3052_v53 = vld [vmem:[#allocation8] sm:$0xff] }
 0x512   :  { %v1695_v55 = vadd.f32 %v3012_v52, %v1694_v54  ;;  %v3050_v52 = vld [vmem:[#allocation8 + $0x10] sm:$0xff] }
 0x514   :  { %2487 = vst.msk [vmem:[%s3650_s11 + $0x20] sm:$0xff] %vm68_vm0, %v1695_v55  ;;  %2869 = vmatmul.mubr.msk.f32.vlgmr.msra.gmra.mxu1 %vm68_vm0, %v1695_v55  ;;  %2880 = vmatmul.mubr.msk.f32.vlgmr.msra.gmra.mxu0 %vm68_vm0, %v1695_v55 }
 0x515   :  { %2883 = vmatpush3.msra.mxu1 %v3286_v21  ;;  %2890 = vmatprep.mubr.msk.f32.mxu1 %vm3102_vm3, %v3101_v0 }
 0x516   :  { %2884 = vmatprep.subr.mxu1 %v3101_v0  ;;  %2894 = vmatpush3.msra.mxu0 %v3185_v5 }
 0x517   :  { %2885 = vmatpush3.msra.mxu1 %v3296_v22  ;;  %2895 = vmatprep.subr.mxu0 %v3101_v0 }
 0x518   :  { %2886 = vmatprep.subr.mxu1 %v3101_v0  ;;  %2896 = vmatpush3.msra.mxu0 %v3207_v9  ;;  %v1842_v9 = vld [vmem:[#allocation2 + $0x28] sm:$0xff] }
 0x519   :  { %2887 = vmatpush3.msra.mxu1 %v3301_v23  ;;  %2897 = vmatprep.subr.mxu0 %v3101_v0 }
 0x51a   :  { %2888 = vmatprep.subr.mxu1 %v3101_v0  ;;  %2898 = vmatpush3.msra.mxu0 %v3218_v11 }
 0x51b   :  { %2889 = vmatpush3.msra.mxu1 %v3307_v24  ;;  %2899 = vmatprep.subr.mxu0 %v3101_v0 }
 0x51c   :  { %2891 = vmatmul.mubr.msk.f32.vlgmr.msra.gmra.mxu1 %vm68_vm0, %v1695_v55  ;;  %2904 = vmatprep.subr.mxu1 %v3101_v0 }
 0x51d   :  { %2905 = vmatpush3.msra.mxu1 %v3257_v17  ;;  %2900 = vmatpush3.msra.mxu0 %v3233_v14 }
 0x51e   :  { %2906 = vmatprep.subr.mxu1 %v3101_v0  ;;  %2901 = vmatprep.mubr.msk.f32.mxu0 %vm3102_vm3, %v3101_v0 }
 0x51f   :  { %2907 = vmatpush3.msra.mxu1 %v3266_v18  ;;  %2912 = vmatprep.mubr.msk.f32.mxu1 %vm3102_vm3, %v3101_v0 }
 0x520   :  { %2908 = vmatprep.subr.mxu1 %v3101_v0  ;;  %2915 = vmatprep.subr.mxu0 %v3101_v0 }
 0x521   :  { %2909 = vmatpush3.msra.mxu1 %v3275_v19 }
 0x522   :  { %2910 = vmatprep.subr.mxu1 %v3101_v0 }
 0x523   :  { %2911 = vmatpush3.msra.mxu1 %v3284_v20 }
 0x524   :  { %2926 = vmatprep.subr.mxu1 %v3101_v0 }
 0x5d4   :  { %v1767_v5 = vpop.f32.mrf.mxu1  ;;  %v1837_v11 = vpop.f32.mrf.mxu0 }
 0x5d5   :  { %v1843_v14 = vadd.f32 %v1842_v9, %v1767_v5  ;;  %v1852_v62 = vadd.f32 %v1851_v61, %v1837_v11 }
 0x5d6   :  { %v2870_v56 = vpop.f32.mrf.mxu1  ;;  %v2881_v57 = vpop.f32.mrf.mxu0 }
 0x5d7   :  { %v2490_v58 = vmul.f32 -1.442695, %v1843_v14  ;;  %v2491_v63 = vmul.f32 -1.442695, %v1852_v62 }
 0x5d9   :  { %3015 = vpow2.f32 %v2490_v58 }
 0x5da   :  { %3017 = vpow2.f32 %v2491_v63 }
 0x5dc   :  { %v1927_v59 = vpop.f32.mrf.mxu1 }
 0x5dd   :  { %v1928_v4 = vadd.f32 %v3375_v40, %v1927_v59  ;;  %v2333_v59 = vld [vmem:[#allocation3 + $0x38] sm:$0xff] }
 0x5de   :  { %v2892_v60 = vpop.f32.mrf.mxu1 }
 0x5e6   :  { %v3016_v1 = vpop.eup %3015 }
 0x5e7   :  { %v1847_v2 = vadd.f32 1.0, %v3016_v1  ;;  %v3018_v3 = vpop.eup %3017 }
 0x5e8   :  { %v1856_v10 = vadd.f32 1.0, %v3018_v3 }
 0x5e9   :  { %3019 = vrcp.f32 %v1847_v2 }
 0x5f6   :  { %v3020_v6 = vpop.eup %3019 }
 0x5f7   :  { %v1931_v7 = vmul.f32 %v3020_v6, %v1928_v4  ;;  %v2342_v4 = vld [vmem:[#allocation4 + $0x38] sm:$0xff] }
 0x5f9   :  { %v1932_v12 = vadd.f32 %v1931_v7, %v1860_v8 }
 0x5fb   :  { %3021 = vtanh.f32 %v1932_v12 }
 0x5fc   :  { %3023 = vrcp.f32 %v1856_v10 }
 0x608   :  { %v3022_v13 = vpop.eup %3021 }
 0x609   :  { %v1934_v15 = vsub.f32 %v1695_v55, %v3022_v13  ;;  %v3024_v25 = vpop.eup %3023  ;;  %v2324_v55 = vld [vmem:[#allocation2 + $0x38] sm:$0xff] }
 0x60b   :  { %v1935_v26 = vmul.f32 %v3024_v25, %v1934_v15 }
 0x60d   :  { %v3569_v27 = vadd.f32 %v3022_v13, %v1935_v26 }
 0x60f   :  { %2493 = vst.msk [vmem:[%s3650_s11 + $0x28] sm:$0xff] %vm68_vm0, %v3569_v27  ;;  %2902 = vmatmul.mubr.msk.f32.vlgmr.msra.gmra.mxu0 %vm68_vm0, %v3569_v27  ;;  %2913 = vmatmul.mubr.msk.f32.vlgmr.msra.gmra.mxu1 %vm68_vm0, %v3569_v27 }
 0x610   :  { %2916 = vmatpush3.msra.mxu0 %v3286_v21  ;;  %2923 = vmatprep.mubr.msk.f32.mxu0 %vm3102_vm3, %v3101_v0  ;;  %v3046_v21 = vld [vmem:[%s3643_s4 + $0x10] sm:$0xff] }
 0x611   :  { %2917 = vmatprep.subr.mxu0 %v3101_v0  ;;  %2927 = vmatpush3.msra.mxu1 %v3045_v28 }
 0x612   :  { %2918 = vmatpush3.msra.mxu0 %v3296_v22  ;;  %2928 = vmatprep.subr.mxu1 %v3101_v0  ;;  %v3048_v22 = vld [vmem:[%s3643_s4] sm:$0xff] }
 0x613   :  { %2919 = vmatprep.subr.mxu0 %v3101_v0  ;;  %2929 = vmatpush3.msra.mxu1 %v3046_v21 }
 0x614   :  { %2920 = vmatpush3.msra.mxu0 %v3301_v23  ;;  %2930 = vmatprep.subr.mxu1 %v3101_v0  ;;  %v2083_v23 = vld [vmem:[#allocation2 + $0x30] sm:$0xff] }
 0x615   :  { %2921 = vmatprep.subr.mxu0 %v3101_v0  ;;  %2931 = vmatpush3.msra.mxu1 %v3047_v29 }
 0x616   :  { %2922 = vmatpush3.msra.mxu0 %v3307_v24  ;;  %2932 = vmatprep.subr.mxu1 %v3101_v0 }
 0x617   :  { %2924 = vmatmul.mubr.msk.f32.vlgmr.msra.gmra.mxu0 %vm68_vm0, %v3569_v27  ;;  %2937 = vmatprep.subr.mxu0 %v3101_v0 }
 0x618   :  { %2938 = vmatpush3.msra.mxu0 %v3257_v17  ;;  %2933 = vmatpush3.msra.mxu1 %v3048_v22 }
 0x619   :  { %2939 = vmatprep.subr.mxu0 %v3101_v0  ;;  %2934 = vmatprep.mubr.msk.f32.mxu1 %vm3102_vm3, %v3101_v0 }
 0x61a   :  { %2940 = vmatpush3.msra.mxu0 %v3266_v18  ;;  %2945 = vmatprep.mubr.msk.f32.mxu0 %vm3102_vm3, %v3101_v0 }
 0x61b   :  { %2941 = vmatprep.subr.mxu0 %v3101_v0  ;;  %2948 = vmatprep.subr.mxu1 %v3101_v0 }
 0x61c   :  { %2942 = vmatpush3.msra.mxu0 %v3275_v19 }
 0x61d   :  { %2943 = vmatprep.subr.mxu0 %v3101_v0 }
 0x61e   :  { %2944 = vmatpush3.msra.mxu0 %v3284_v20 }
 0x6cf   :  { %v2008_v17 = vpop.f32.mrf.mxu0  ;;  %v2078_v24 = vpop.f32.mrf.mxu1 }
 0x6d0   :  { %v2084_v30 = vadd.f32 %v2083_v23, %v2008_v17  ;;  %v2093_v36 = vadd.f32 %v2092_v35, %v2078_v24 }
 0x6d1   :  { %v2903_v31 = vpop.f32.mrf.mxu0  ;;  %v2914_v32 = vpop.f32.mrf.mxu1 }
 0x6d2   :  { %v2496_v18 = vmul.f32 -1.442695, %v2084_v30  ;;  %v2497_v37 = vmul.f32 -1.442695, %v2093_v36 }
 0x6d4   :  { %3025 = vpow2.f32 %v2496_v18 }
 0x6d5   :  { %3027 = vpow2.f32 %v2497_v37 }
 0x6d7   :  { %v2168_v33 = vpop.f32.mrf.mxu0 }
 0x6d8   :  { %v2169_v20 = vadd.f32 %v3375_v40, %v2168_v33 }
 0x6d9   :  { %v2925_v34 = vpop.f32.mrf.mxu0 }
 0x6e1   :  { %v3026_v38 = vpop.eup %3025 }
 0x6e2   :  { %v2088_v39 = vadd.f32 1.0, %v3026_v38  ;;  %v3028_v19 = vpop.eup %3027 }
 0x6e3   :  { %v2097_v44 = vadd.f32 1.0, %v3028_v19 }
 0x6e4   :  { %3029 = vrcp.f32 %v2088_v39 }
 0x6f1   :  { %v3030_v41 = vpop.eup %3029 }
 0x6f2   :  { %v2172_v42 = vmul.f32 %v3030_v41, %v2169_v20 }
 0x6f4   :  { %v2173_v45 = vadd.f32 %v2172_v42, %v2101_v43 }
 0x6f6   :  { %3031 = vtanh.f32 %v2173_v45 }
 0x6f7   :  { %3033 = vrcp.f32 %v2097_v44 }
 0x703   :  { %v3032_v46 = vpop.eup %3031 }
 0x704   :  { %v2175_v47 = vsub.f32 %v3569_v27, %v3032_v46  ;;  %v3034_v48 = vpop.eup %3033 }
 0x706   :  { %v2176_v49 = vmul.f32 %v3034_v48, %v2175_v47 }
 0x708   :  { %v2177_v50 = vadd.f32 %v3032_v46, %v2176_v49 }
 0x70a   :  { %2499 = vst.msk [vmem:[%s3650_s11 + $0x30] sm:$0xff] %vm68_vm0, %v2177_v50  ;;  %2935 = vmatmul.mubr.msk.f32.vlgmr.msra.gmra.mxu1 %vm68_vm0, %v2177_v50  ;;  %2946 = vmatmul.mubr.msk.f32.vlgmr.msra.gmra.mxu0 %vm68_vm0, %v2177_v50 }
 0x70b   :  { %2949 = vmatpush3.msra.mxu1 %v3049_v51  ;;  %2956 = vmatprep.mubr.msk.f32.mxu1 %vm3102_vm3, %v3101_v0 }
 0x70c   :  { %2950 = vmatprep.subr.mxu1 %v3101_v0 }
 0x70d   :  { %2951 = vmatpush3.msra.mxu1 %v3050_v52 }
 0x70e   :  { %2952 = vmatprep.subr.mxu1 %v3101_v0 }
 0x70f   :  { %2953 = vmatpush3.msra.mxu1 %v3051_v16 }
 0x710   :  { %2954 = vmatprep.subr.mxu1 %v3101_v0 }
 0x711   :  { %2955 = vmatpush3.msra.mxu1 %v3052_v53 }
 0x712   :  { %2957 = vmatmul.mubr.msk.f32.vlgmr.msra.gmra.mxu1 %vm68_vm0, %v2177_v50 }
 0x7ca   :  { %v2249_v54 = vpop.f32.mrf.mxu1  ;;  %v2319_v5 = vpop.f32.mrf.mxu0 }
 0x7cb   :  { %v2325_v9 = vadd.f32 %v2324_v55, %v2249_v54  ;;  %v2334_v60 = vadd.f32 %v2333_v59, %v2319_v5 }
 0x7cc   :  { %v2936_v11 = vpop.f32.mrf.mxu1  ;;  %v2947_v14 = vpop.f32.mrf.mxu0 }
 0x7cd   :  { %v2502_v56 = vmul.f32 -1.442695, %v2325_v9  ;;  %v2503_v61 = vmul.f32 -1.442695, %v2334_v60 }
 0x7cf   :  { %3035 = vpow2.f32 %v2502_v56 }
 0x7d0   :  { %3037 = vpow2.f32 %v2503_v61 }
 0x7d2   :  { %v2409_v57 = vpop.f32.mrf.mxu1 }
 0x7d3   :  { %v2410_v1 = vadd.f32 %v3375_v40, %v2409_v57 }
 0x7d4   :  { %v2958_v58 = vpop.f32.mrf.mxu1 }
 0x7dc   :  { %v3036_v62 = vpop.eup %3035 }
 0x7dd   :  { %v2329_v63 = vadd.f32 1.0, %v3036_v62  ;;  %v3038_v0 = vpop.eup %3037 }
 0x7de   :  { %v2338_v6 = vadd.f32 1.0, %v3038_v0 }
 0x7df   :  { %3039 = vrcp.f32 %v2329_v63 }
 0x7ec   :  { %v3040_v2 = vpop.eup %3039 }
 0x7ed   :  { %v2413_v3 = vmul.f32 %v3040_v2, %v2410_v1 }
 0x7ef   :  { %v2414_v7 = vadd.f32 %v2413_v3, %v2342_v4 }
 0x7f1   :  { %3041 = vtanh.f32 %v2414_v7 }
 0x7f2   :  { %3043 = vrcp.f32 %v2338_v6 }
 0x7fe   :  { %v3042_v8 = vpop.eup %3041 }
 0x7ff   :  { %v2416_v10 = vsub.f32 %v2177_v50, %v3042_v8  ;;  %v3044_v12 = vpop.eup %3043 }
 0x801   :  { %v2417_v13 = vmul.f32 %v3044_v12, %v2416_v10 }
 0x803   :  { %v2418_v15 = vadd.f32 %v3042_v8, %v2417_v13 }
 0x805   :  { %2505 = vst.msk [vmem:[%s3650_s11 + $0x38] sm:$0xff] %vm68_vm0, %v2418_v15  ;;  %2421 = vst.msk [vmem:[#allocation5] sm:$0xff] %vm68_vm0, %v2418_v15 }
 0x806   :  { %2426 = vsyncpa [#allocation7], 1 }
 0x807   :  { %2427 = vsyncpa [#allocation9], 1 }

</bundles_post_ra>
